<compile_context>
chip_gen: v6e
topology: v6e:2x2x1
jax: 0.10.0
libtpu: 0.0.40
codegen_flags: <defaults>
</compile_context>

<pallas_src>
import functools
import math

import jax
import jax.numpy as jnp
from jax.experimental import pallas as pl
from jax.experimental.pallas import tpu as pltpu

NUM_HEADS = 4      # bert.config.num_attention_heads
OUT_PAD = 128      # lane-dense fused output width: [hidden | logits | zero pad]


def _softmax_last(x):
    m = jnp.max(x, axis=-1, keepdims=True)
    e = jnp.exp(x - m)
    return e * pl.reciprocal(jnp.sum(e, axis=-1, keepdims=True), approx=True)


def fast_lcf_kernel(gcf_ref, lcf_ref, wqkv_ref, bqkv_ref, wp_ref, bp_ref,
                    wf_ref, bfu_ref, out_ref, *, block_b, seq_len, num_heads):
    S = seq_len
    H = gcf_ref.shape[-1]
    dh = H // num_heads
    scale = 1.0 / math.sqrt(dh)

    gcf_all = gcf_ref[...]                      # (block_b*S, H) f32
    lcf_all = lcf_ref[...]                      # (block_b*S, 1) f32
    # lcf_features = global_context_features * lcf_vec.unsqueeze(2)
    lcf_x = gcf_all * lcf_all                   # (block_b*S, H)

    # --- fused Q|K|V projection for every row in this block: 1 bf16 MXU matmul
    qkv = jnp.dot(lcf_x.astype(jnp.bfloat16), wqkv_ref[...],
                  preferred_element_type=jnp.float32) + bqkv_ref[...]   # (bb*S, 3H)

    wp = wp_ref[...]            # (H, H)        bf16
    bp = bp_ref[...]            # (1, H)        f32
    wf = wf_ref[...]            # (3H, OUT_PAD) bf16  (linear3 | linear3∘dense | 0-pad)
    bfu = bfu_ref[...]          # (1, OUT_PAD)  f32

    for bb in range(block_b):                   # static unroll over batch rows
        rows = slice(bb * S, (bb + 1) * S)      # sublane-aligned static slice
        gcf = gcf_all[rows, :]                  # (S, H)
        q = qkv[rows, 0:H]
        k = qkv[rows, H:2 * H]
        v = qkv[rows, 2 * H:3 * H]

        # --- Encoder(bert_SA): BertSelfAttention (zero additive mask) + tanh ---
        ctx = []
        for h in range(num_heads):              # static unroll over heads
            cols = slice(h * dh, (h + 1) * dh)
            scores = jnp.dot(q[:, cols], k[:, cols].T,
                             preferred_element_type=jnp.float32) * scale
            probs = _softmax_last(scores)                               # (S, S)
            ctx.append(jnp.dot(probs, v[:, cols],
                               preferred_element_type=jnp.float32))
        lcf_sa = jnp.tanh(jnp.concatenate(ctx, axis=-1))                # (S, H)

        # --- alpha attention over the global context ---
        # softmax_t( sum_s lcf_sa[s]·gcf[t] ) == softmax_t( (sum_s lcf_sa)·gcf[t] )
        sum_sa = jnp.sum(lcf_sa, axis=0, keepdims=True)                 # (1, H)
        alpha = _softmax_last(jnp.dot(sum_sa, gcf.T,
                                      preferred_element_type=jnp.float32))  # (1, S)
        lcf_att = jnp.dot(alpha, gcf, preferred_element_type=jnp.float32)   # (1, H)

        # --- shared BertPooler on both CLS tokens: one stacked matmul ---
        pool_in = jnp.concatenate([gcf[0:1, :], lcf_sa[0:1, :]], axis=0)    # (2, H)
        pools = jnp.tanh(jnp.dot(pool_in.astype(jnp.bfloat16), wp,
                                 preferred_element_type=jnp.float32) + bp)  # (2, H)

        # --- fused linear3 + dense: one lane-dense 128-wide output row ---
        row = (jnp.dot(pools[0:1, :].astype(jnp.bfloat16), wf[0:H, :],
                       preferred_element_type=jnp.float32) +
               jnp.dot(lcf_att.astype(jnp.bfloat16), wf[H:2 * H, :],
                       preferred_element_type=jnp.float32) +
               jnp.dot(pools[1:2, :].astype(jnp.bfloat16), wf[2 * H:3 * H, :],
                       preferred_element_type=jnp.float32) +
               bfu)                                                         # (1, OUT_PAD)
        out_ref[bb] = row


def _pick_block_b(batch, max_block=8):
    """Rows per grid step: batch as many rows as possible while keeping >= 2
    'parallel' grid steps (feeds both v7x TensorCores; v5e/v6e have 1 TC so
    larger blocks are a pure win anyway)."""
    if batch <= 2:
        return 1
    best = 1
    for cand in range(2, min(max_block, batch // 2) + 1):
        if batch % cand == 0:
            best = cand
    return best


def fast_lcf_bert_att_forward(gcf, lcf_vec, params, *, num_heads=NUM_HEADS):
    """gcf: (B, S, H) last_hidden_state; lcf_vec: (B, S)."""
    B, S, H = gcf.shape
    out_dim = params['bd'].shape[0]
    assert H % num_heads == 0
    assert H + out_dim <= OUT_PAD

    f32, bf16 = jnp.float32, jnp.bfloat16

    # ---- wrapper-side weight packing ----
    wqkv = jnp.concatenate([params['wq'], params['wk'], params['wv']],
                           axis=1).astype(bf16)                          # (H, 3H)
    bqkv = jnp.concatenate([params['bq'], params['bk'],
                            params['bv']]).reshape(1, 3 * H).astype(f32)
    wp = params['wp'].astype(bf16)                                       # (H, H)
    bp = params['bp'].reshape(1, H).astype(f32)

    # Fuse linear3 + dense into one lane-dense (3H, OUT_PAD) weight:
    #   cols [0, H)           -> hidden   (linear3)
    #   cols [H, H + out_dim) -> logits   (dense ∘ linear3, composed weights)
    w3, b3 = params['w3'].astype(f32), params['b3'].astype(f32)
    wd, bd = params['wd'].astype(f32), params['bd'].astype(f32)
    wf = jnp.zeros((3 * H, OUT_PAD), f32)
    wf = wf.at[:, :H].set(w3)
    wf = wf.at[:, H:H + out_dim].set(w3 @ wd)
    wf = wf.astype(bf16)
    bfu = jnp.zeros((1, OUT_PAD), f32)
    bfu = bfu.at[0, :H].set(b3)
    bfu = bfu.at[0, H:H + out_dim].set(b3 @ wd + bd)

    # ---- activations: flatten (B, S) into one row axis ----
    gcf2 = gcf.astype(f32).reshape(B * S, H)
    lcf2 = lcf_vec.astype(f32).reshape(B * S, 1)

    block_b = _pick_block_b(B)
    grid = (B // block_b,)

    kernel = functools.partial(fast_lcf_kernel, block_b=block_b,
                               seq_len=S, num_heads=num_heads)

    weights = [wqkv, bqkv, wp, bp, wf, bfu]
    in_specs = ([pl.BlockSpec((block_b * S, H), lambda i: (i, 0)),
                 pl.BlockSpec((block_b * S, 1), lambda i: (i, 0))] +
                [pl.BlockSpec(w.shape, lambda i: (0, 0)) for w in weights])

    slab = pl.pallas_call(
        kernel,
        grid=grid,
        in_specs=in_specs,
        out_specs=pl.BlockSpec((block_b, 1, OUT_PAD), lambda i: (i, 0, 0)),
        out_shape=jax.ShapeDtypeStruct((B, 1, OUT_PAD), f32),
        compiler_params=pltpu.CompilerParams(dimension_semantics=("parallel",)),
    )(gcf2, lcf2, *weights)

    slab = slab[:, 0, :]
    return {'logits': slab[:, H:H + out_dim], 'hidden_state': slab[:, :H]}


def synthetic_bert_last_hidden_state(text_indices, emb_table, pos_table):
    # TODO(synk): the pretrained `bert4global` encoder has no clean in-script Pallas
    # equivalent; it is modeled as a deterministic token+position embedding lookup
    # (plain-JAX glue) producing last_hidden_state.
    tok = emb_table[text_indices]
    pos = pos_table[: text_indices.shape[1]][None]
    return jnp.tanh(tok + pos)


def init_params(key, H, out_dim):
    ks = jax.random.split(key, 12)
    w = lambda k, fi, fo: jax.random.normal(k, (fi, fo), jnp.float32) * 0.05
    b = lambda k, fo: jax.random.normal(k, (fo,), jnp.float32) * 0.01
    return {
        'wq': w(ks[0], H, H), 'bq': b(ks[1], H),
        'wk': w(ks[2], H, H), 'bk': b(ks[3], H),
        'wv': w(ks[4], H, H), 'bv': b(ks[5], H),
        'wp': w(ks[6], H, H), 'bp': b(ks[7], H),      # bert_pooler (shared)
        'w3': w(ks[8], 3 * H, H), 'b3': b(ks[9], H),  # linear3
        'wd': w(ks[10], H, out_dim), 'bd': b(ks[11], out_dim),  # dense
    }


def reference_forward(gcf, lcf_vec, params):
    """Pure-JAX f32 reference mirroring the PyTorch forward."""
    B, S, H = gcf.shape
    dh = H // NUM_HEADS
    lcf = gcf * lcf_vec[:, :, None]
    q = lcf @ params['wq'] + params['bq']
    k = lcf @ params['wk'] + params['bk']
    v = lcf @ params['wv'] + params['bv']
    split = lambda x: x.reshape(B, S, NUM_HEADS, dh).transpose(0, 2, 1, 3)
    qh, kh, vh = split(q), split(k), split(v)
    scores = jnp.einsum('bhqd,bhkd->bhqk', qh, kh) / math.sqrt(dh)
    probs = jax.nn.softmax(scores, axis=-1)
    ctx = jnp.einsum('bhqk,bhkd->bhqd', probs, vh).transpose(0, 2, 1, 3).reshape(B, S, H)
    lcf_sa = jnp.tanh(ctx)
    alpha_mat = jnp.einsum('bsh,bth->bst', lcf_sa, gcf)
    alpha = jax.nn.softmax(jnp.sum(alpha_mat, axis=1, keepdims=True), axis=2)
    lcf_att = jnp.einsum('bos,bsh->boh', alpha, gcf)[:, 0]
    gpool = jnp.tanh(gcf[:, 0] @ params['wp'] + params['bp'])
    lpool = jnp.tanh(lcf_sa[:, 0] @ params['wp'] + params['bp'])
    hidden = jnp.concatenate([gpool, lcf_att, lpool], axis=-1) @ params['w3'] + params['b3']
    logits = hidden @ params['wd'] + params['bd']
    return {'logits': logits, 'hidden_state': hidden}


if __name__ == "__main__":
    # B=4 so block_b=2 (multi-row grid step) is exercised while keeping 2
    # parallel grid steps; embed_dim=64, output_dim=3, max_seq_len=16.
    B, S, H, OUT_DIM, VOCAB = 4, 16, 64, 3, 101
    key = jax.random.PRNGKey(0)
    k_inp, k_par, k_emb, k_pos, k_lcf = jax.random.split(key, 5)

    # module inputs: text_indices, text_raw_bert_indices, lcf_vec (use_bert_spc=True)
    text_indices = jax.random.randint(k_inp, (B, S), 0, VOCAB)
    text_raw_bert_indices = text_indices   # text_local_indices is never consumed
    lcf_vec = jax.random.uniform(k_lcf, (B, S), jnp.float32)

    emb_table = jax.random.normal(k_emb, (VOCAB, H), jnp.float32) * 0.1
    pos_table = jax.random.normal(k_pos, (S, H), jnp.float32) * 0.02
    params = init_params(k_par, H, OUT_DIM)

    gcf = synthetic_bert_last_hidden_state(text_indices, emb_table, pos_table)

    out = fast_lcf_bert_att_forward(gcf, lcf_vec, params)
    jax.block_until_ready(out)

    ref = reference_forward(gcf, lcf_vec, params)
    assert out['logits'].shape == (B, OUT_DIM)
    assert out['hidden_state'].shape == (B, H)
    # bf16 MXU operands + approx softmax reciprocal => ~1e-3 abs error vs f32 ref.
    assert jnp.allclose(out['logits'], ref['logits'], atol=1e-2, rtol=1e-2)
    assert jnp.allclose(out['hidden_state'], ref['hidden_state'], atol=1e-2, rtol=1e-2)
    print("KERNEL_OK")
</pallas_src>

<mosaic_0001>
module attributes {stable_mosaic.version = 11 : i64} {
  func.func @fast_lcf_kernel(%arg0: i32, %arg1: memref<32x64xf32, #tpu.memory_space<vmem>>, %arg2: memref<32x1xf32, #tpu.memory_space<vmem>>, %arg3: memref<64x192xbf16, #tpu.memory_space<vmem>>, %arg4: memref<1x192xf32, #tpu.memory_space<vmem>>, %arg5: memref<64x64xbf16, #tpu.memory_space<vmem>>, %arg6: memref<1x64xf32, #tpu.memory_space<vmem>>, %arg7: memref<192x128xbf16, #tpu.memory_space<vmem>>, %arg8: memref<1x128xf32, #tpu.memory_space<vmem>>, %arg9: memref<2x1x128xf32, #tpu.memory_space<vmem>>) attributes {dimension_semantics = [#tpu.dimension_semantics<parallel>], iteration_bounds = array<i64: 2>, scalar_prefetch = 0 : i64, scratch_operands = 0 : i64, tpu.core_type = #tpu.core_type<tc>, window_params = [{transform_indices = @transform_0, window_bounds = array<i64: 32, 64>}, {transform_indices = @transform_1, window_bounds = array<i64: 32, 1>}, {pipeline_mode = #tpu.pipeline_mode<synchronous>, transform_indices = @transform_2, window_bounds = array<i64: 64, 192>}, {pipeline_mode = #tpu.pipeline_mode<synchronous>, transform_indices = @transform_3, window_bounds = array<i64: 1, 192>}, {pipeline_mode = #tpu.pipeline_mode<synchronous>, transform_indices = @transform_4, window_bounds = array<i64: 64, 64>}, {pipeline_mode = #tpu.pipeline_mode<synchronous>, transform_indices = @transform_5, window_bounds = array<i64: 1, 64>}, {pipeline_mode = #tpu.pipeline_mode<synchronous>, transform_indices = @transform_6, window_bounds = array<i64: 192, 128>}, {pipeline_mode = #tpu.pipeline_mode<synchronous>, transform_indices = @transform_7, window_bounds = array<i64: 1, 128>}, {transform_indices = @transform_8, window_bounds = array<i64: 2, 1, 128>}]} {
    %c0 = arith.constant 0 : index
    %c0_0 = arith.constant 0 : index
    %0 = vector.load %arg1[%c0, %c0_0] : memref<32x64xf32, #tpu.memory_space<vmem>>, vector<32x64xf32>
    %c0_1 = arith.constant 0 : index
    %c0_2 = arith.constant 0 : index
    %1 = vector.load %arg2[%c0_1, %c0_2] : memref<32x1xf32, #tpu.memory_space<vmem>>, vector<32x1xf32>
    %2 = vector.broadcast %1 : vector<32x1xf32> to vector<32x64xf32>
    %3 = arith.mulf %0, %2 : vector<32x64xf32>
    %4 = arith.truncf %3 : vector<32x64xf32> to vector<32x64xbf16>
    %c0_3 = arith.constant 0 : index
    %c0_4 = arith.constant 0 : index
    %5 = vector.load %arg3[%c0_3, %c0_4] : memref<64x192xbf16, #tpu.memory_space<vmem>>, vector<64x192xbf16>
    %cst = arith.constant dense<0.000000e+00> : vector<32x192xf32>
    %6 = tpu.matmul %4, %5, %cst {dimension_numbers = #tpu.dot_dimension_numbers<[1], [0], [0], [1], [0, 0, 1, 1], [], []>} : vector<32x64xbf16>, vector<64x192xbf16>, vector<32x192xf32> -> vector<32x192xf32>
    %c0_5 = arith.constant 0 : index
    %c0_6 = arith.constant 0 : index
    %7 = vector.load %arg4[%c0_5, %c0_6] : memref<1x192xf32, #tpu.memory_space<vmem>>, vector<1x192xf32>
    %8 = vector.broadcast %7 : vector<1x192xf32> to vector<32x192xf32>
    %9 = arith.addf %6, %8 : vector<32x192xf32>
    %c0_7 = arith.constant 0 : index
    %c0_8 = arith.constant 0 : index
    %10 = vector.load %arg5[%c0_7, %c0_8] : memref<64x64xbf16, #tpu.memory_space<vmem>>, vector<64x64xbf16>
    %c0_9 = arith.constant 0 : index
    %c0_10 = arith.constant 0 : index
    %11 = vector.load %arg6[%c0_9, %c0_10] : memref<1x64xf32, #tpu.memory_space<vmem>>, vector<1x64xf32>
    %c0_11 = arith.constant 0 : index
    %c0_12 = arith.constant 0 : index
    %12 = vector.load %arg7[%c0_11, %c0_12] : memref<192x128xbf16, #tpu.memory_space<vmem>>, vector<192x128xbf16>
    %c0_13 = arith.constant 0 : index
    %c0_14 = arith.constant 0 : index
    %13 = vector.load %arg8[%c0_13, %c0_14] : memref<1x128xf32, #tpu.memory_space<vmem>>, vector<1x128xf32>
    %14 = vector.extract_strided_slice %0 {offsets = [0, 0], sizes = [16, 64], strides = [1, 1]} : vector<32x64xf32> to vector<16x64xf32>
    %15 = vector.extract_strided_slice %9 {offsets = [0, 0], sizes = [16, 64], strides = [1, 1]} : vector<32x192xf32> to vector<16x64xf32>
    %16 = vector.extract_strided_slice %9 {offsets = [0, 64], sizes = [16, 64], strides = [1, 1]} : vector<32x192xf32> to vector<16x64xf32>
    %17 = vector.extract_strided_slice %9 {offsets = [0, 128], sizes = [16, 64], strides = [1, 1]} : vector<32x192xf32> to vector<16x64xf32>
    %18 = vector.extract_strided_slice %15 {offsets = [0, 0], sizes = [16, 16], strides = [1, 1]} : vector<16x64xf32> to vector<16x16xf32>
    %19 = vector.extract_strided_slice %16 {offsets = [0, 0], sizes = [16, 16], strides = [1, 1]} : vector<16x64xf32> to vector<16x16xf32>
    %20 = tpu.transpose %19, [1, 0] : vector<16x16xf32> -> vector<16x16xf32>
    %cst_15 = arith.constant dense<0.000000e+00> : vector<16x16xf32>
    %21 = tpu.matmul %18, %20, %cst_15 {dimension_numbers = #tpu.dot_dimension_numbers<[1], [0], [0], [1], [0, 0, 1, 1], [], []>} : vector<16x16xf32>, vector<16x16xf32>, vector<16x16xf32> -> vector<16x16xf32>
    %cst_16 = arith.constant 2.500000e-01 : f32
    %22 = vector.broadcast %cst_16 : f32 to vector<16x16xf32>
    %23 = arith.mulf %21, %22 : vector<16x16xf32>
    %cst_17 = arith.constant dense<0xFF800000> : vector<16xf32>
    %24 = vector.multi_reduction <maximumf>, %23, %cst_17 [1] : vector<16x16xf32> to vector<16xf32>
    %25 = vector.shape_cast %24 : vector<16xf32> to vector<16x1xf32>
    %26 = vector.broadcast %25 : vector<16x1xf32> to vector<16x16xf32>
    %27 = arith.subf %23, %26 : vector<16x16xf32>
    %28 = math.exp %27 : vector<16x16xf32>
    %cst_18 = arith.constant dense<0.000000e+00> : vector<16xf32>
    %29 = vector.multi_reduction <add>, %28, %cst_18 [1] : vector<16x16xf32> to vector<16xf32>
    %30 = vector.shape_cast %29 : vector<16xf32> to vector<16x1xf32>
    %31 = tpu.reciprocal %30 {approx = true} : vector<16x1xf32> -> vector<16x1xf32>
    %32 = vector.broadcast %31 : vector<16x1xf32> to vector<16x16xf32>
    %33 = arith.mulf %28, %32 : vector<16x16xf32>
    %34 = vector.extract_strided_slice %17 {offsets = [0, 0], sizes = [16, 16], strides = [1, 1]} : vector<16x64xf32> to vector<16x16xf32>
    %cst_19 = arith.constant dense<0.000000e+00> : vector<16x16xf32>
    %35 = tpu.matmul %33, %34, %cst_19 {dimension_numbers = #tpu.dot_dimension_numbers<[1], [0], [0], [1], [0, 0, 1, 1], [], []>} : vector<16x16xf32>, vector<16x16xf32>, vector<16x16xf32> -> vector<16x16xf32>
    %36 = vector.extract_strided_slice %15 {offsets = [0, 16], sizes = [16, 16], strides = [1, 1]} : vector<16x64xf32> to vector<16x16xf32>
    %37 = vector.extract_strided_slice %16 {offsets = [0, 16], sizes = [16, 16], strides = [1, 1]} : vector<16x64xf32> to vector<16x16xf32>
    %38 = tpu.transpose %37, [1, 0] : vector<16x16xf32> -> vector<16x16xf32>
    %cst_20 = arith.constant dense<0.000000e+00> : vector<16x16xf32>
    %39 = tpu.matmul %36, %38, %cst_20 {dimension_numbers = #tpu.dot_dimension_numbers<[1], [0], [0], [1], [0, 0, 1, 1], [], []>} : vector<16x16xf32>, vector<16x16xf32>, vector<16x16xf32> -> vector<16x16xf32>
    %cst_21 = arith.constant 2.500000e-01 : f32
    %40 = vector.broadcast %cst_21 : f32 to vector<16x16xf32>
    %41 = arith.mulf %39, %40 : vector<16x16xf32>
    %cst_22 = arith.constant dense<0xFF800000> : vector<16xf32>
    %42 = vector.multi_reduction <maximumf>, %41, %cst_22 [1] : vector<16x16xf32> to vector<16xf32>
    %43 = vector.shape_cast %42 : vector<16xf32> to vector<16x1xf32>
    %44 = vector.broadcast %43 : vector<16x1xf32> to vector<16x16xf32>
    %45 = arith.subf %41, %44 : vector<16x16xf32>
    %46 = math.exp %45 : vector<16x16xf32>
    %cst_23 = arith.constant dense<0.000000e+00> : vector<16xf32>
    %47 = vector.multi_reduction <add>, %46, %cst_23 [1] : vector<16x16xf32> to vector<16xf32>
    %48 = vector.shape_cast %47 : vector<16xf32> to vector<16x1xf32>
    %49 = tpu.reciprocal %48 {approx = true} : vector<16x1xf32> -> vector<16x1xf32>
    %50 = vector.broadcast %49 : vector<16x1xf32> to vector<16x16xf32>
    %51 = arith.mulf %46, %50 : vector<16x16xf32>
    %52 = vector.extract_strided_slice %17 {offsets = [0, 16], sizes = [16, 16], strides = [1, 1]} : vector<16x64xf32> to vector<16x16xf32>
    %cst_24 = arith.constant dense<0.000000e+00> : vector<16x16xf32>
    %53 = tpu.matmul %51, %52, %cst_24 {dimension_numbers = #tpu.dot_dimension_numbers<[1], [0], [0], [1], [0, 0, 1, 1], [], []>} : vector<16x16xf32>, vector<16x16xf32>, vector<16x16xf32> -> vector<16x16xf32>
    %54 = vector.extract_strided_slice %15 {offsets = [0, 32], sizes = [16, 16], strides = [1, 1]} : vector<16x64xf32> to vector<16x16xf32>
    %55 = vector.extract_strided_slice %16 {offsets = [0, 32], sizes = [16, 16], strides = [1, 1]} : vector<16x64xf32> to vector<16x16xf32>
    %56 = tpu.transpose %55, [1, 0] : vector<16x16xf32> -> vector<16x16xf32>
    %cst_25 = arith.constant dense<0.000000e+00> : vector<16x16xf32>
    %57 = tpu.matmul %54, %56, %cst_25 {dimension_numbers = #tpu.dot_dimension_numbers<[1], [0], [0], [1], [0, 0, 1, 1], [], []>} : vector<16x16xf32>, vector<16x16xf32>, vector<16x16xf32> -> vector<16x16xf32>
    %cst_26 = arith.constant 2.500000e-01 : f32
    %58 = vector.broadcast %cst_26 : f32 to vector<16x16xf32>
    %59 = arith.mulf %57, %58 : vector<16x16xf32>
    %cst_27 = arith.constant dense<0xFF800000> : vector<16xf32>
    %60 = vector.multi_reduction <maximumf>, %59, %cst_27 [1] : vector<16x16xf32> to vector<16xf32>
    %61 = vector.shape_cast %60 : vector<16xf32> to vector<16x1xf32>
    %62 = vector.broadcast %61 : vector<16x1xf32> to vector<16x16xf32>
    %63 = arith.subf %59, %62 : vector<16x16xf32>
    %64 = math.exp %63 : vector<16x16xf32>
    %cst_28 = arith.constant dense<0.000000e+00> : vector<16xf32>
    %65 = vector.multi_reduction <add>, %64, %cst_28 [1] : vector<16x16xf32> to vector<16xf32>
    %66 = vector.shape_cast %65 : vector<16xf32> to vector<16x1xf32>
    %67 = tpu.reciprocal %66 {approx = true} : vector<16x1xf32> -> vector<16x1xf32>
    %68 = vector.broadcast %67 : vector<16x1xf32> to vector<16x16xf32>
    %69 = arith.mulf %64, %68 : vector<16x16xf32>
    %70 = vector.extract_strided_slice %17 {offsets = [0, 32], sizes = [16, 16], strides = [1, 1]} : vector<16x64xf32> to vector<16x16xf32>
    %cst_29 = arith.constant dense<0.000000e+00> : vector<16x16xf32>
    %71 = tpu.matmul %69, %70, %cst_29 {dimension_numbers = #tpu.dot_dimension_numbers<[1], [0], [0], [1], [0, 0, 1, 1], [], []>} : vector<16x16xf32>, vector<16x16xf32>, vector<16x16xf32> -> vector<16x16xf32>
    %72 = vector.extract_strided_slice %15 {offsets = [0, 48], sizes = [16, 16], strides = [1, 1]} : vector<16x64xf32> to vector<16x16xf32>
    %73 = vector.extract_strided_slice %16 {offsets = [0, 48], sizes = [16, 16], strides = [1, 1]} : vector<16x64xf32> to vector<16x16xf32>
    %74 = tpu.transpose %73, [1, 0] : vector<16x16xf32> -> vector<16x16xf32>
    %cst_30 = arith.constant dense<0.000000e+00> : vector<16x16xf32>
    %75 = tpu.matmul %72, %74, %cst_30 {dimension_numbers = #tpu.dot_dimension_numbers<[1], [0], [0], [1], [0, 0, 1, 1], [], []>} : vector<16x16xf32>, vector<16x16xf32>, vector<16x16xf32> -> vector<16x16xf32>
    %cst_31 = arith.constant 2.500000e-01 : f32
    %76 = vector.broadcast %cst_31 : f32 to vector<16x16xf32>
    %77 = arith.mulf %75, %76 : vector<16x16xf32>
    %cst_32 = arith.constant dense<0xFF800000> : vector<16xf32>
    %78 = vector.multi_reduction <maximumf>, %77, %cst_32 [1] : vector<16x16xf32> to vector<16xf32>
    %79 = vector.shape_cast %78 : vector<16xf32> to vector<16x1xf32>
    %80 = vector.broadcast %79 : vector<16x1xf32> to vector<16x16xf32>
    %81 = arith.subf %77, %80 : vector<16x16xf32>
    %82 = math.exp %81 : vector<16x16xf32>
    %cst_33 = arith.constant dense<0.000000e+00> : vector<16xf32>
    %83 = vector.multi_reduction <add>, %82, %cst_33 [1] : vector<16x16xf32> to vector<16xf32>
    %84 = vector.shape_cast %83 : vector<16xf32> to vector<16x1xf32>
    %85 = tpu.reciprocal %84 {approx = true} : vector<16x1xf32> -> vector<16x1xf32>
    %86 = vector.broadcast %85 : vector<16x1xf32> to vector<16x16xf32>
    %87 = arith.mulf %82, %86 : vector<16x16xf32>
    %88 = vector.extract_strided_slice %17 {offsets = [0, 48], sizes = [16, 16], strides = [1, 1]} : vector<16x64xf32> to vector<16x16xf32>
    %cst_34 = arith.constant dense<0.000000e+00> : vector<16x16xf32>
    %89 = tpu.matmul %87, %88, %cst_34 {dimension_numbers = #tpu.dot_dimension_numbers<[1], [0], [0], [1], [0, 0, 1, 1], [], []>} : vector<16x16xf32>, vector<16x16xf32>, vector<16x16xf32> -> vector<16x16xf32>
    %90 = tpu.concatenate %35, %53, %71, %89 in 1 : vector<16x16xf32>, vector<16x16xf32>, vector<16x16xf32>, vector<16x16xf32> -> vector<16x64xf32>
    %91 = math.tanh %90 : vector<16x64xf32>
    %cst_35 = arith.constant dense<0.000000e+00> : vector<64xf32>
    %92 = vector.multi_reduction <add>, %91, %cst_35 [0] : vector<16x64xf32> to vector<64xf32>
    %93 = vector.shape_cast %92 : vector<64xf32> to vector<1x64xf32>
    %94 = tpu.transpose %14, [1, 0] : vector<16x64xf32> -> vector<64x16xf32>
    %cst_36 = arith.constant dense<0.000000e+00> : vector<1x16xf32>
    %95 = tpu.matmul %93, %94, %cst_36 {dimension_numbers = #tpu.dot_dimension_numbers<[1], [0], [0], [1], [0, 0, 1, 1], [], []>} : vector<1x64xf32>, vector<64x16xf32>, vector<1x16xf32> -> vector<1x16xf32>
    %cst_37 = arith.constant dense<0xFF800000> : vector<1xf32>
    %96 = vector.multi_reduction <maximumf>, %95, %cst_37 [1] : vector<1x16xf32> to vector<1xf32>
    %97 = vector.shape_cast %96 : vector<1xf32> to vector<1x1xf32>
    %98 = vector.broadcast %97 : vector<1x1xf32> to vector<1x16xf32>
    %99 = arith.subf %95, %98 : vector<1x16xf32>
    %100 = math.exp %99 : vector<1x16xf32>
    %cst_38 = arith.constant dense<0.000000e+00> : vector<1xf32>
    %101 = vector.multi_reduction <add>, %100, %cst_38 [1] : vector<1x16xf32> to vector<1xf32>
    %102 = vector.shape_cast %101 : vector<1xf32> to vector<1x1xf32>
    %103 = tpu.reciprocal %102 {approx = true} : vector<1x1xf32> -> vector<1x1xf32>
    %104 = vector.broadcast %103 : vector<1x1xf32> to vector<1x16xf32>
    %105 = arith.mulf %100, %104 : vector<1x16xf32>
    %cst_39 = arith.constant dense<0.000000e+00> : vector<1x64xf32>
    %106 = tpu.matmul %105, %14, %cst_39 {dimension_numbers = #tpu.dot_dimension_numbers<[1], [0], [0], [1], [0, 0, 1, 1], [], []>} : vector<1x16xf32>, vector<16x64xf32>, vector<1x64xf32> -> vector<1x64xf32>
    %107 = vector.extract_strided_slice %14 {offsets = [0, 0], sizes = [1, 64], strides = [1, 1]} : vector<16x64xf32> to vector<1x64xf32>
    %108 = vector.extract_strided_slice %91 {offsets = [0, 0], sizes = [1, 64], strides = [1, 1]} : vector<16x64xf32> to vector<1x64xf32>
    %109 = tpu.concatenate %107, %108 in 0 : vector<1x64xf32>, vector<1x64xf32> -> vector<2x64xf32>
    %110 = arith.truncf %109 : vector<2x64xf32> to vector<2x64xbf16>
    %cst_40 = arith.constant dense<0.000000e+00> : vector<2x64xf32>
    %111 = tpu.matmul %110, %10, %cst_40 {dimension_numbers = #tpu.dot_dimension_numbers<[1], [0], [0], [1], [0, 0, 1, 1], [], []>} : vector<2x64xbf16>, vector<64x64xbf16>, vector<2x64xf32> -> vector<2x64xf32>
    %112 = vector.broadcast %11 : vector<1x64xf32> to vector<2x64xf32>
    %113 = arith.addf %111, %112 : vector<2x64xf32>
    %114 = math.tanh %113 : vector<2x64xf32>
    %115 = vector.extract_strided_slice %114 {offsets = [0, 0], sizes = [1, 64], strides = [1, 1]} : vector<2x64xf32> to vector<1x64xf32>
    %116 = arith.truncf %115 : vector<1x64xf32> to vector<1x64xbf16>
    %117 = vector.extract_strided_slice %12 {offsets = [0, 0], sizes = [64, 128], strides = [1, 1]} : vector<192x128xbf16> to vector<64x128xbf16>
    %cst_41 = arith.constant dense<0.000000e+00> : vector<1x128xf32>
    %118 = tpu.matmul %116, %117, %cst_41 {dimension_numbers = #tpu.dot_dimension_numbers<[1], [0], [0], [1], [0, 0, 1, 1], [], []>} : vector<1x64xbf16>, vector<64x128xbf16>, vector<1x128xf32> -> vector<1x128xf32>
    %119 = arith.truncf %106 : vector<1x64xf32> to vector<1x64xbf16>
    %120 = vector.extract_strided_slice %12 {offsets = [64, 0], sizes = [64, 128], strides = [1, 1]} : vector<192x128xbf16> to vector<64x128xbf16>
    %cst_42 = arith.constant dense<0.000000e+00> : vector<1x128xf32>
    %121 = tpu.matmul %119, %120, %cst_42 {dimension_numbers = #tpu.dot_dimension_numbers<[1], [0], [0], [1], [0, 0, 1, 1], [], []>} : vector<1x64xbf16>, vector<64x128xbf16>, vector<1x128xf32> -> vector<1x128xf32>
    %122 = arith.addf %118, %121 : vector<1x128xf32>
    %123 = vector.extract_strided_slice %114 {offsets = [1, 0], sizes = [1, 64], strides = [1, 1]} : vector<2x64xf32> to vector<1x64xf32>
    %124 = arith.truncf %123 : vector<1x64xf32> to vector<1x64xbf16>
    %125 = vector.extract_strided_slice %12 {offsets = [128, 0], sizes = [64, 128], strides = [1, 1]} : vector<192x128xbf16> to vector<64x128xbf16>
    %cst_43 = arith.constant dense<0.000000e+00> : vector<1x128xf32>
    %126 = tpu.matmul %124, %125, %cst_43 {dimension_numbers = #tpu.dot_dimension_numbers<[1], [0], [0], [1], [0, 0, 1, 1], [], []>} : vector<1x64xbf16>, vector<64x128xbf16>, vector<1x128xf32> -> vector<1x128xf32>
    %127 = arith.addf %122, %126 : vector<1x128xf32>
    %128 = arith.addf %127, %13 : vector<1x128xf32>
    %c0_44 = arith.constant 0 : index
    %c0_45 = arith.constant 0 : index
    %c0_46 = arith.constant 0 : index
    %129 = vector.load %arg9[%c0_44, %c0_45, %c0_46] : memref<2x1x128xf32, #tpu.memory_space<vmem>>, vector<1x1x128xf32>
    %130 = vector.shape_cast %129 : vector<1x1x128xf32> to vector<1x128xf32>
    %131 = vector.shape_cast %128 : vector<1x128xf32> to vector<1x1x128xf32>
    tpu.vector_store %arg9[%c0_44, %c0_45, %c0_46], %131 {strides = array<i32>} : memref<2x1x128xf32, #tpu.memory_space<vmem>>, vector<1x1x128xf32>,
    %132 = vector.extract_strided_slice %0 {offsets = [16, 0], sizes = [16, 64], strides = [1, 1]} : vector<32x64xf32> to vector<16x64xf32>
    %133 = vector.extract_strided_slice %9 {offsets = [16, 0], sizes = [16, 64], strides = [1, 1]} : vector<32x192xf32> to vector<16x64xf32>
    %134 = vector.extract_strided_slice %9 {offsets = [16, 64], sizes = [16, 64], strides = [1, 1]} : vector<32x192xf32> to vector<16x64xf32>
    %135 = vector.extract_strided_slice %9 {offsets = [16, 128], sizes = [16, 64], strides = [1, 1]} : vector<32x192xf32> to vector<16x64xf32>
    %136 = vector.extract_strided_slice %133 {offsets = [0, 0], sizes = [16, 16], strides = [1, 1]} : vector<16x64xf32> to vector<16x16xf32>
    %137 = vector.extract_strided_slice %134 {offsets = [0, 0], sizes = [16, 16], strides = [1, 1]} : vector<16x64xf32> to vector<16x16xf32>
    %138 = tpu.transpose %137, [1, 0] : vector<16x16xf32> -> vector<16x16xf32>
    %cst_47 = arith.constant dense<0.000000e+00> : vector<16x16xf32>
    %139 = tpu.matmul %136, %138, %cst_47 {dimension_numbers = #tpu.dot_dimension_numbers<[1], [0], [0], [1], [0, 0, 1, 1], [], []>} : vector<16x16xf32>, vector<16x16xf32>, vector<16x16xf32> -> vector<16x16xf32>
    %cst_48 = arith.constant 2.500000e-01 : f32
    %140 = vector.broadcast %cst_48 : f32 to vector<16x16xf32>
    %141 = arith.mulf %139, %140 : vector<16x16xf32>
    %cst_49 = arith.constant dense<0xFF800000> : vector<16xf32>
    %142 = vector.multi_reduction <maximumf>, %141, %cst_49 [1] : vector<16x16xf32> to vector<16xf32>
    %143 = vector.shape_cast %142 : vector<16xf32> to vector<16x1xf32>
    %144 = vector.broadcast %143 : vector<16x1xf32> to vector<16x16xf32>
    %145 = arith.subf %141, %144 : vector<16x16xf32>
    %146 = math.exp %145 : vector<16x16xf32>
    %cst_50 = arith.constant dense<0.000000e+00> : vector<16xf32>
    %147 = vector.multi_reduction <add>, %146, %cst_50 [1] : vector<16x16xf32> to vector<16xf32>
    %148 = vector.shape_cast %147 : vector<16xf32> to vector<16x1xf32>
    %149 = tpu.reciprocal %148 {approx = true} : vector<16x1xf32> -> vector<16x1xf32>
    %150 = vector.broadcast %149 : vector<16x1xf32> to vector<16x16xf32>
    %151 = arith.mulf %146, %150 : vector<16x16xf32>
    %152 = vector.extract_strided_slice %135 {offsets = [0, 0], sizes = [16, 16], strides = [1, 1]} : vector<16x64xf32> to vector<16x16xf32>
    %cst_51 = arith.constant dense<0.000000e+00> : vector<16x16xf32>
    %153 = tpu.matmul %151, %152, %cst_51 {dimension_numbers = #tpu.dot_dimension_numbers<[1], [0], [0], [1], [0, 0, 1, 1], [], []>} : vector<16x16xf32>, vector<16x16xf32>, vector<16x16xf32> -> vector<16x16xf32>
    %154 = vector.extract_strided_slice %133 {offsets = [0, 16], sizes = [16, 16], strides = [1, 1]} : vector<16x64xf32> to vector<16x16xf32>
    %155 = vector.extract_strided_slice %134 {offsets = [0, 16], sizes = [16, 16], strides = [1, 1]} : vector<16x64xf32> to vector<16x16xf32>
    %156 = tpu.transpose %155, [1, 0] : vector<16x16xf32> -> vector<16x16xf32>
    %cst_52 = arith.constant dense<0.000000e+00> : vector<16x16xf32>
    %157 = tpu.matmul %154, %156, %cst_52 {dimension_numbers = #tpu.dot_dimension_numbers<[1], [0], [0], [1], [0, 0, 1, 1], [], []>} : vector<16x16xf32>, vector<16x16xf32>, vector<16x16xf32> -> vector<16x16xf32>
    %cst_53 = arith.constant 2.500000e-01 : f32
    %158 = vector.broadcast %cst_53 : f32 to vector<16x16xf32>
    %159 = arith.mulf %157, %158 : vector<16x16xf32>
    %cst_54 = arith.constant dense<0xFF800000> : vector<16xf32>
    %160 = vector.multi_reduction <maximumf>, %159, %cst_54 [1] : vector<16x16xf32> to vector<16xf32>
    %161 = vector.shape_cast %160 : vector<16xf32> to vector<16x1xf32>
    %162 = vector.broadcast %161 : vector<16x1xf32> to vector<16x16xf32>
    %163 = arith.subf %159, %162 : vector<16x16xf32>
    %164 = math.exp %163 : vector<16x16xf32>
    %cst_55 = arith.constant dense<0.000000e+00> : vector<16xf32>
    %165 = vector.multi_reduction <add>, %164, %cst_55 [1] : vector<16x16xf32> to vector<16xf32>
    %166 = vector.shape_cast %165 : vector<16xf32> to vector<16x1xf32>
    %167 = tpu.reciprocal %166 {approx = true} : vector<16x1xf32> -> vector<16x1xf32>
    %168 = vector.broadcast %167 : vector<16x1xf32> to vector<16x16xf32>
    %169 = arith.mulf %164, %168 : vector<16x16xf32>
    %170 = vector.extract_strided_slice %135 {offsets = [0, 16], sizes = [16, 16], strides = [1, 1]} : vector<16x64xf32> to vector<16x16xf32>
    %cst_56 = arith.constant dense<0.000000e+00> : vector<16x16xf32>
    %171 = tpu.matmul %169, %170, %cst_56 {dimension_numbers = #tpu.dot_dimension_numbers<[1], [0], [0], [1], [0, 0, 1, 1], [], []>} : vector<16x16xf32>, vector<16x16xf32>, vector<16x16xf32> -> vector<16x16xf32>
    %172 = vector.extract_strided_slice %133 {offsets = [0, 32], sizes = [16, 16], strides = [1, 1]} : vector<16x64xf32> to vector<16x16xf32>
    %173 = vector.extract_strided_slice %134 {offsets = [0, 32], sizes = [16, 16], strides = [1, 1]} : vector<16x64xf32> to vector<16x16xf32>
    %174 = tpu.transpose %173, [1, 0] : vector<16x16xf32> -> vector<16x16xf32>
    %cst_57 = arith.constant dense<0.000000e+00> : vector<16x16xf32>
    %175 = tpu.matmul %172, %174, %cst_57 {dimension_numbers = #tpu.dot_dimension_numbers<[1], [0], [0], [1], [0, 0, 1, 1], [], []>} : vector<16x16xf32>, vector<16x16xf32>, vector<16x16xf32> -> vector<16x16xf32>
    %cst_58 = arith.constant 2.500000e-01 : f32
    %176 = vector.broadcast %cst_58 : f32 to vector<16x16xf32>
    %177 = arith.mulf %175, %176 : vector<16x16xf32>
    %cst_59 = arith.constant dense<0xFF800000> : vector<16xf32>
    %178 = vector.multi_reduction <maximumf>, %177, %cst_59 [1] : vector<16x16xf32> to vector<16xf32>
    %179 = vector.shape_cast %178 : vector<16xf32> to vector<16x1xf32>
    %180 = vector.broadcast %179 : vector<16x1xf32> to vector<16x16xf32>
    %181 = arith.subf %177, %180 : vector<16x16xf32>
    %182 = math.exp %181 : vector<16x16xf32>
    %cst_60 = arith.constant dense<0.000000e+00> : vector<16xf32>
    %183 = vector.multi_reduction <add>, %182, %cst_60 [1] : vector<16x16xf32> to vector<16xf32>
    %184 = vector.shape_cast %183 : vector<16xf32> to vector<16x1xf32>
    %185 = tpu.reciprocal %184 {approx = true} : vector<16x1xf32> -> vector<16x1xf32>
    %186 = vector.broadcast %185 : vector<16x1xf32> to vector<16x16xf32>
    %187 = arith.mulf %182, %186 : vector<16x16xf32>
    %188 = vector.extract_strided_slice %135 {offsets = [0, 32], sizes = [16, 16], strides = [1, 1]} : vector<16x64xf32> to vector<16x16xf32>
    %cst_61 = arith.constant dense<0.000000e+00> : vector<16x16xf32>
    %189 = tpu.matmul %187, %188, %cst_61 {dimension_numbers = #tpu.dot_dimension_numbers<[1], [0], [0], [1], [0, 0, 1, 1], [], []>} : vector<16x16xf32>, vector<16x16xf32>, vector<16x16xf32> -> vector<16x16xf32>
    %190 = vector.extract_strided_slice %133 {offsets = [0, 48], sizes = [16, 16], strides = [1, 1]} : vector<16x64xf32> to vector<16x16xf32>
    %191 = vector.extract_strided_slice %134 {offsets = [0, 48], sizes = [16, 16], strides = [1, 1]} : vector<16x64xf32> to vector<16x16xf32>
    %192 = tpu.transpose %191, [1, 0] : vector<16x16xf32> -> vector<16x16xf32>
    %cst_62 = arith.constant dense<0.000000e+00> : vector<16x16xf32>
    %193 = tpu.matmul %190, %192, %cst_62 {dimension_numbers = #tpu.dot_dimension_numbers<[1], [0], [0], [1], [0, 0, 1, 1], [], []>} : vector<16x16xf32>, vector<16x16xf32>, vector<16x16xf32> -> vector<16x16xf32>
    %cst_63 = arith.constant 2.500000e-01 : f32
    %194 = vector.broadcast %cst_63 : f32 to vector<16x16xf32>
    %195 = arith.mulf %193, %194 : vector<16x16xf32>
    %cst_64 = arith.constant dense<0xFF800000> : vector<16xf32>
    %196 = vector.multi_reduction <maximumf>, %195, %cst_64 [1] : vector<16x16xf32> to vector<16xf32>
    %197 = vector.shape_cast %196 : vector<16xf32> to vector<16x1xf32>
    %198 = vector.broadcast %197 : vector<16x1xf32> to vector<16x16xf32>
    %199 = arith.subf %195, %198 : vector<16x16xf32>
    %200 = math.exp %199 : vector<16x16xf32>
    %cst_65 = arith.constant dense<0.000000e+00> : vector<16xf32>
    %201 = vector.multi_reduction <add>, %200, %cst_65 [1] : vector<16x16xf32> to vector<16xf32>
    %202 = vector.shape_cast %201 : vector<16xf32> to vector<16x1xf32>
    %203 = tpu.reciprocal %202 {approx = true} : vector<16x1xf32> -> vector<16x1xf32>
    %204 = vector.broadcast %203 : vector<16x1xf32> to vector<16x16xf32>
    %205 = arith.mulf %200, %204 : vector<16x16xf32>
    %206 = vector.extract_strided_slice %135 {offsets = [0, 48], sizes = [16, 16], strides = [1, 1]} : vector<16x64xf32> to vector<16x16xf32>
    %cst_66 = arith.constant dense<0.000000e+00> : vector<16x16xf32>
    %207 = tpu.matmul %205, %206, %cst_66 {dimension_numbers = #tpu.dot_dimension_numbers<[1], [0], [0], [1], [0, 0, 1, 1], [], []>} : vector<16x16xf32>, vector<16x16xf32>, vector<16x16xf32> -> vector<16x16xf32>
    %208 = tpu.concatenate %153, %171, %189, %207 in 1 : vector<16x16xf32>, vector<16x16xf32>, vector<16x16xf32>, vector<16x16xf32> -> vector<16x64xf32>
    %209 = math.tanh %208 : vector<16x64xf32>
    %cst_67 = arith.constant dense<0.000000e+00> : vector<64xf32>
    %210 = vector.multi_reduction <add>, %209, %cst_67 [0] : vector<16x64xf32> to vector<64xf32>
    %211 = vector.shape_cast %210 : vector<64xf32> to vector<1x64xf32>
    %212 = tpu.transpose %132, [1, 0] : vector<16x64xf32> -> vector<64x16xf32>
    %cst_68 = arith.constant dense<0.000000e+00> : vector<1x16xf32>
    %213 = tpu.matmul %211, %212, %cst_68 {dimension_numbers = #tpu.dot_dimension_numbers<[1], [0], [0], [1], [0, 0, 1, 1], [], []>} : vector<1x64xf32>, vector<64x16xf32>, vector<1x16xf32> -> vector<1x16xf32>
    %cst_69 = arith.constant dense<0xFF800000> : vector<1xf32>
    %214 = vector.multi_reduction <maximumf>, %213, %cst_69 [1] : vector<1x16xf32> to vector<1xf32>
    %215 = vector.shape_cast %214 : vector<1xf32> to vector<1x1xf32>
    %216 = vector.broadcast %215 : vector<1x1xf32> to vector<1x16xf32>
    %217 = arith.subf %213, %216 : vector<1x16xf32>
    %218 = math.exp %217 : vector<1x16xf32>
    %cst_70 = arith.constant dense<0.000000e+00> : vector<1xf32>
    %219 = vector.multi_reduction <add>, %218, %cst_70 [1] : vector<1x16xf32> to vector<1xf32>
    %220 = vector.shape_cast %219 : vector<1xf32> to vector<1x1xf32>
    %221 = tpu.reciprocal %220 {approx = true} : vector<1x1xf32> -> vector<1x1xf32>
    %222 = vector.broadcast %221 : vector<1x1xf32> to vector<1x16xf32>
    %223 = arith.mulf %218, %222 : vector<1x16xf32>
    %cst_71 = arith.constant dense<0.000000e+00> : vector<1x64xf32>
    %224 = tpu.matmul %223, %132, %cst_71 {dimension_numbers = #tpu.dot_dimension_numbers<[1], [0], [0], [1], [0, 0, 1, 1], [], []>} : vector<1x16xf32>, vector<16x64xf32>, vector<1x64xf32> -> vector<1x64xf32>
    %225 = vector.extract_strided_slice %132 {offsets = [0, 0], sizes = [1, 64], strides = [1, 1]} : vector<16x64xf32> to vector<1x64xf32>
    %226 = vector.extract_strided_slice %209 {offsets = [0, 0], sizes = [1, 64], strides = [1, 1]} : vector<16x64xf32> to vector<1x64xf32>
    %227 = tpu.concatenate %225, %226 in 0 : vector<1x64xf32>, vector<1x64xf32> -> vector<2x64xf32>
    %228 = arith.truncf %227 : vector<2x64xf32> to vector<2x64xbf16>
    %cst_72 = arith.constant dense<0.000000e+00> : vector<2x64xf32>
    %229 = tpu.matmul %228, %10, %cst_72 {dimension_numbers = #tpu.dot_dimension_numbers<[1], [0], [0], [1], [0, 0, 1, 1], [], []>} : vector<2x64xbf16>, vector<64x64xbf16>, vector<2x64xf32> -> vector<2x64xf32>
    %230 = vector.broadcast %11 : vector<1x64xf32> to vector<2x64xf32>
    %231 = arith.addf %229, %230 : vector<2x64xf32>
    %232 = math.tanh %231 : vector<2x64xf32>
    %233 = vector.extract_strided_slice %232 {offsets = [0, 0], sizes = [1, 64], strides = [1, 1]} : vector<2x64xf32> to vector<1x64xf32>
    %234 = arith.truncf %233 : vector<1x64xf32> to vector<1x64xbf16>
    %235 = vector.extract_strided_slice %12 {offsets = [0, 0], sizes = [64, 128], strides = [1, 1]} : vector<192x128xbf16> to vector<64x128xbf16>
    %cst_73 = arith.constant dense<0.000000e+00> : vector<1x128xf32>
    %236 = tpu.matmul %234, %235, %cst_73 {dimension_numbers = #tpu.dot_dimension_numbers<[1], [0], [0], [1], [0, 0, 1, 1], [], []>} : vector<1x64xbf16>, vector<64x128xbf16>, vector<1x128xf32> -> vector<1x128xf32>
    %237 = arith.truncf %224 : vector<1x64xf32> to vector<1x64xbf16>
    %238 = vector.extract_strided_slice %12 {offsets = [64, 0], sizes = [64, 128], strides = [1, 1]} : vector<192x128xbf16> to vector<64x128xbf16>
    %cst_74 = arith.constant dense<0.000000e+00> : vector<1x128xf32>
    %239 = tpu.matmul %237, %238, %cst_74 {dimension_numbers = #tpu.dot_dimension_numbers<[1], [0], [0], [1], [0, 0, 1, 1], [], []>} : vector<1x64xbf16>, vector<64x128xbf16>, vector<1x128xf32> -> vector<1x128xf32>
    %240 = arith.addf %236, %239 : vector<1x128xf32>
    %241 = vector.extract_strided_slice %232 {offsets = [1, 0], sizes = [1, 64], strides = [1, 1]} : vector<2x64xf32> to vector<1x64xf32>
    %242 = arith.truncf %241 : vector<1x64xf32> to vector<1x64xbf16>
    %243 = vector.extract_strided_slice %12 {offsets = [128, 0], sizes = [64, 128], strides = [1, 1]} : vector<192x128xbf16> to vector<64x128xbf16>
    %cst_75 = arith.constant dense<0.000000e+00> : vector<1x128xf32>
    %244 = tpu.matmul %242, %243, %cst_75 {dimension_numbers = #tpu.dot_dimension_numbers<[1], [0], [0], [1], [0, 0, 1, 1], [], []>} : vector<1x64xbf16>, vector<64x128xbf16>, vector<1x128xf32> -> vector<1x128xf32>
    %245 = arith.addf %240, %244 : vector<1x128xf32>
    %246 = arith.addf %245, %13 : vector<1x128xf32>
    %c1 = arith.constant 1 : index
    %c0_76 = arith.constant 0 : index
    %c0_77 = arith.constant 0 : index
    %247 = vector.load %arg9[%c1, %c0_76, %c0_77] : memref<2x1x128xf32, #tpu.memory_space<vmem>>, vector<1x1x128xf32>
    %248 = vector.shape_cast %247 : vector<1x1x128xf32> to vector<1x128xf32>
    %249 = vector.shape_cast %246 : vector<1x128xf32> to vector<1x1x128xf32>
    tpu.vector_store %arg9[%c1, %c0_76, %c0_77], %249 {strides = array<i32>} : memref<2x1x128xf32, #tpu.memory_space<vmem>>, vector<1x1x128xf32>,
    return
  }
  func.func @transform_0(%arg0: i32) -> (i32, i32) {
    %c0_i32 = arith.constant 0 : i32
    %c0_i32_0 = arith.constant 0 : i32
    return %arg0, %c0_i32 : i32, i32
  }
  func.func @transform_1(%arg0: i32) -> (i32, i32) {
    %c0_i32 = arith.constant 0 : i32
    %c0_i32_0 = arith.constant 0 : i32
    return %arg0, %c0_i32 : i32, i32
  }
  func.func @transform_2(%arg0: i32) -> (i32, i32) {
    %c0_i32 = arith.constant 0 : i32
    %c0_i32_0 = arith.constant 0 : i32
    %c0_i32_1 = arith.constant 0 : i32
    return %c0_i32, %c0_i32_0 : i32, i32
  }
  func.func @transform_3(%arg0: i32) -> (i32, i32) {
    %c0_i32 = arith.constant 0 : i32
    %c0_i32_0 = arith.constant 0 : i32
    %c0_i32_1 = arith.constant 0 : i32
    return %c0_i32, %c0_i32_0 : i32, i32
  }
  func.func @transform_4(%arg0: i32) -> (i32, i32) {
    %c0_i32 = arith.constant 0 : i32
    %c0_i32_0 = arith.constant 0 : i32
    %c0_i32_1 = arith.constant 0 : i32
    return %c0_i32, %c0_i32_0 : i32, i32
  }
  func.func @transform_5(%arg0: i32) -> (i32, i32) {
    %c0_i32 = arith.constant 0 : i32
    %c0_i32_0 = arith.constant 0 : i32
    %c0_i32_1 = arith.constant 0 : i32
    return %c0_i32, %c0_i32_0 : i32, i32
  }
  func.func @transform_6(%arg0: i32) -> (i32, i32) {
    %c0_i32 = arith.constant 0 : i32
    %c0_i32_0 = arith.constant 0 : i32
    %c0_i32_1 = arith.constant 0 : i32
    return %c0_i32, %c0_i32_0 : i32, i32
  }
  func.func @transform_7(%arg0: i32) -> (i32, i32) {
    %c0_i32 = arith.constant 0 : i32
    %c0_i32_0 = arith.constant 0 : i32
    %c0_i32_1 = arith.constant 0 : i32
    return %c0_i32, %c0_i32_0 : i32, i32
  }
  func.func @transform_8(%arg0: i32) -> (i32, i32, i32) {
    %c0_i32 = arith.constant 0 : i32
    %c0_i32_0 = arith.constant 0 : i32
    %c0_i32_1 = arith.constant 0 : i32
    return %arg0, %c0_i32, %c0_i32_0 : i32, i32, i32
  }
}

</mosaic_0001>

<bundles_post_ra>
// kernel: tpu_custom_call.1
= control target key start
LH: loop header
LB: loop body
LE: loop exit
PB: predicated region body
PF: predicated region fallthrough
CT: control target
= control target key end

     0   :  { %13 = vsyncpa [#allocation3], 0  ;;  %s4696_s0 = inlined_call_operand.vmem [shape: f32[64,64], index: 0, kind: input, shape index: {}]   ;;  %s4697_s1 = inlined_call_operand.vmem [shape: f32[64,1], index: 1, kind: input, shape index: {}]   ;;  %s4698_s2 = inlined_call_operand.hbm [shape: bf16[64,192], index: 2, kind: input, shape index: {}]   ;;  %s4699_s3 = inlined_call_operand.vmem [shape: f32[1,192], index: 3, kind: input, shape index: {}]   ;;  %s4700_s4 = inlined_call_operand.hbm [shape: bf16[64,64], index: 4, kind: input, shape index: {}]   ;;  %s4701_s5 = inlined_call_operand.vmem [shape: f32[1,64], index: 5, kind: input, shape index: {}]   ;;  %s4702_s6 = inlined_call_operand.hbm [shape: bf16[192,128], index: 6, kind: input, shape index: {}]   ;;  %s4703_s7 = inlined_call_operand.vmem [shape: f32[1,128], index: 7, kind: input, shape index: {}]   ;;  %s4704_s8 = inlined_call_operand.hbm [shape: f32[4,1,128], index: 8, kind: output, shape index: {}]  }
   0x1   :  { %14 = vsyncpa [#allocation6], 0 }
   0x2   :  { %15 = vsyncpa [#allocation4], 0 }
   0x3   :  { %17 = vsyncpa [#allocation4 + $0x1], 0  ;;  %s4049_s27 = smov 0   ;;  %s4051_s28 = smov 0  }
   0x4   :  { %s4053_s29 = smov 0   ;;  %s4055_s30 = smov 0  }
   0x5 LB: > { %s4070_s9 = sadd.s32 4294967295, %s3983_s30   ;;  %s3171_s10 = sadd.s32 4294967294, %s3983_s30   ;;  %s3983_s30 = sphi %s4055_s30, %s4712_s30   ;;  %s3979_s29 = sphi %s4053_s29, %s4711_s29   ;;  %s3975_s28 = sphi %s4051_s28, %s4710_s28   ;;  %s3971_s27 = sphi %s4049_s27, %s4709_s27  }
   0x6   : > { %s4074_s11 = sadd.s32 1, %s3983_s30   ;;  %s208_s12 = sadd.s32 1, %s3979_s29 }
   0x7   : > { %s205_s13 = ssub.s32 %s3983_s30, %s4074_s11  ;;  %p218_p0 = scmp.ne.s32.totalorder %s3979_s29, %s3975_s28 }
   0x8   : > { %p206_p1 = scmp.eq.s32.totalorder %s205_s13, 0  ;;  %p219_p2 = scmp.eq.s32.totalorder %s4070_s9, 1 }
   0x9   : > { %p224_p3 = scmp.ne.s32.totalorder %s3975_s28, %s3971_s27  ;;  %p225_p4 = scmp.eq.s32.totalorder %s3171_s10, 1 }
   0xa   : > { %s4085_s14 = scalar_select %p206_p1, %s3979_s29, %s208_s12  }
   0xb   : > { %p4087_p5 = por %p219_p2, %p218_p0  ;;  %p4091_p6 = por %p225_p4, %p224_p3 }
   0xc   : > { %p3172_p7 = scmp.ge.s32.totalorder %s3983_s30, 1  ;;  %p232_p8 = scmp.lt.s32.totalorder %s3983_s30, 3 }
   0xd   : > { %p3664_p9 = scmp.eq.s32.totalorder %s4070_s9, 0  ;;  %s3985_s18 = smov [#allocation5]  }
   0xe   : > { %p4098_p10 = pnand %p3172_p7, %p232_p8  ;;  %s260_s19 = sshll.u32 %s3985_s18, 4  ;;  %s261_s19 = int_to_ptr.vmem [resolvable:$true] %s260_s19 }
   0xf   : > { %s3986_s21 = smov [#allocation2]   ;;  %s3848_s23 = scalar_lea.vmem %s261_s19, 512 }
  0x10   : > { %p3650_p11 = pneg %p4098_p10  ;;  %s244_s22 = sshll.u32 %s3986_s21, 4  ;;  %s245_s22 = int_to_ptr.vmem [resolvable:$true] %s244_s22 }
  0x11   : > { %p3849_p0 = scmp.ne.s32.totalorder %s261_s19, %s3848_s23  ;;  %p3856_p3 = scmp.lt.s32.totalorder %s261_s19, %s261_s19 }
  0x12   : > { %p4106_p12 = pnand %p3664_p9, %p3650_p11  ;;  %p3857_p4 = scmp.lt.s32.totalorder %s3848_s23, %s3848_s23 }
  0x14   : > { %p3839_p13 = pneg %p4106_p12  ;;  %p3858_p7 = por %p3857_p4, %p3856_p3 }
  0x16   : > { %p3851_p1 = pnand %p3849_p0, %p3839_p13 }
  0x18   : > { %p3852_p2 = pneg %p3851_p1 }
  0x1a   : > { %p3859_p8 = pnand %p3858_p7, %p3852_p2 }
  0x1c   : > { %3862 = shalt.err (!%p3859_p8)
}
  0x1d   : > { %s3987_s24 = smov 64   ;;  %s3988_s25 = smov 4  }
  0x1e   : > { %3656 = dma.hbm_to_vmem [thread:$0]  (!%p4106_p12), %s4700_s4, 512, %s261_s19, [#allocation6], %s3987_s24, %s3987_s24, %s3988_s25  }
  0x1f   : > { %s3874_s12 = scalar_lea.vmem %s245_s22, 1024  ;;  %p3882_p2 = scmp.lt.s32.totalorder %s245_s22, %s245_s22 }
  0x20   : > { %p3875_p11 = scmp.ne.s32.totalorder %s245_s22, %s3874_s12  ;;  %p3883_p3 = scmp.lt.s32.totalorder %s3874_s12, %s3874_s12 }
  0x22   : > { %p3877_p0 = pnand %p3875_p11, %p3839_p13  ;;  %p3884_p4 = por %p3883_p3, %p3882_p2 }
  0x24   : > { %p3878_p1 = pneg %p3877_p0 }
  0x26   : > { %p3885_p7 = pnand %p3884_p4, %p3878_p1 }
  0x28   : > { %3888 = shalt.err (!%p3885_p7)
}
  0x29   : > { %s3989_s13 = smov 128   ;;  %s3990_s18 = smov 8  }
  0x2a   : > { %3653 = dma.hbm_to_vmem [thread:$0]  (!%p4106_p12), %s4698_s2, 1024, %s245_s22, [#allocation3], %s3989_s13, %s3989_s13, %s3990_s18  }
  0x2b   : > { %s3991_s19 = smov [#allocation7]  }
  0x2c   : > { %s276_s26 = sshll.u32 %s3991_s19, 4  ;;  %s277_s26 = int_to_ptr.vmem [resolvable:$true] %s276_s26 }
  0x2d   : > { %s3900_s10 = scalar_lea.vmem %s277_s26, 1536  ;;  %p3908_p1 = scmp.lt.s32.totalorder %s277_s26, %s277_s26 }
  0x2e   : > { %p3901_p8 = scmp.ne.s32.totalorder %s277_s26, %s3900_s10  ;;  %p3909_p2 = scmp.lt.s32.totalorder %s3900_s10, %s3900_s10 }
  0x30   : > { %p3903_p11 = pnand %p3901_p8, %p3839_p13  ;;  %p3910_p3 = por %p3909_p2, %p3908_p1 }
  0x32   : > { %p3904_p0 = pneg %p3903_p11 }
  0x34   : > { %p3911_p4 = pnand %p3910_p3, %p3904_p0 }
  0x36   : > { %3914 = shalt.err (!%p3911_p4)
}
  0x37   : > { %3659 = dma.hbm_to_vmem [thread:$0]  (!%p4106_p12), %s4702_s6, 1536, %s277_s26, [#allocation6], %s3987_s24, %s3987_s24, %s3988_s25  }
  0x38   : > { %313 = sbr.rel (%p4098_p10) target bundleno = 6117 (0x17e5), region = 52 }
  0x3d   : > { %3958 = dma.done.wait (%p3664_p9), [#allocation3], 1024  }
  0x3e   : > { %3960 = vsyncadd (%p3664_p9), [#allocation3], 4294966272 }
  0x3f   : > { %3962 = dma.done.wait (%p3664_p9), [#allocation6], 2048  }
  0x40   : > { %3964 = vsyncadd (%p3664_p9), [#allocation6], 4294965248  ;;  %s3182_s20 = sshll.u32 %s4070_s9, 2  ;;  %v3992_v0 = vmov 0   ;;  %v3723_v3 = vld [vmem:[#allocation2 + $0x34] ss:$8 sps:$4 sm:$0xff]   ;;  %v418_v18 = vlaneseq }
  0x41   : > { %3721 = vset.pattern.permute.xlu0 %v3992_v0  ;;  %p361_p12 = scmp.lt.s32.totalorder %s3182_s20, 7  ;;  %507 = vmatprep.mubr.bf16.mxu0 %v3992_v0  ;;  %v3725_v4 = vld [vmem:[#allocation2 + $0x30] ss:$8 sps:$4 sm:$0xff]   ;;  %v3726_v5 = vld [vmem:[#allocation2 + $0x24] ss:$8 sps:$4 sm:$0xff]   ;;  %vm468_vm0 = vcmask 523264  }
  0x42   : > { %3722 = vset.pattern.permute.xlu1 %v3992_v0  ;;  %483 = vmatprep.subr.bf16.mxu0 %v3723_v3  ;;  %v3728_v6 = vld [vmem:[#allocation2 + $0x20] ss:$8 sps:$4 sm:$0xff]   ;;  %v3729_v7 = vld [vmem:[#allocation2 + $0x14] ss:$8 sps:$4 sm:$0xff]   ;;  %v3731_v8 = vld [vmem:[#allocation2 + $0x10] ss:$8 sps:$4 sm:$0xff]  }
  0x43   : > { %s4714_s20 = smov (!%p361_p12, %s3182_s20), 7  ;;  %484 = vmatpush1.bf16.msra.mxu0 %v3725_v4  ;;  %v3732_v9 = vld [vmem:[#allocation2 + $0x4] ss:$8 sps:$4 sm:$0xff]   ;;  %v3734_v10 = vld [vmem:[#allocation2] ss:$8 sps:$4 sm:$0xff]   ;;  %v419_v19 = vshrl.u32 %v418_v18, 7 }
  0x44   : > { %s3183_s17 = sshll.u32 %s4714_s20, 3  ;;  %485 = vmatprep.subr.bf16.mxu0 %v3726_v5  ;;  %v416_v21 = vld [vmem:[%s4699_s3] sm:$0x3]  ;;  %vm568_vm1 = vcmask 130048   ;;  %s3993_s10 = smov 64   ;;  %vm4001_vm2 = vmmov 0  }
  0x45   : > { %s4156_s13 = scalar_lea.vmem %s4697_s1, %s3183_s17  ;;  %s4163_s23 = scalar_lea.vmem %s4696_s0, %s3183_s17  ;;  %v420_v20 = vsub.s32 0, %v419_v19  ;;  %v424_v28 = vsub.s32 1, %v419_v19  ;;  %vm1391_vm3 = vcmask 261120   ;;  %vm1394_vm4 = vcmask 392192  }
  0x46   : > { %v378_v1 = vld [vmem:[%s4156_s13] sm:$0xff]  ;;  %v379_v2 = vld [vmem:[%s4156_s13 + $0x8] sm:$0xff]  ;;  %v380_v41 = vld [vmem:[%s4156_s13 + $0x10] sm:$0xff]  ;;  %s3994_s22 = smov 48   ;;  %s3995_s12 = smov 112   ;;  %vm1487_vm5 = vcmask 122880  }
  0x47   : > { %384 = vperm.xlu0 %3721, %v378_v1   ;;  %486 = vmatpush1.bf16.msra.mxu0 %v3728_v6  ;;  %v4166_v12 = vld [vmem:[%s4163_s23] sm:$0xff]  ;;  %v4169_v13 = vld [vmem:[%s4163_s23 + $0x8] sm:$0xff]  ;;  %v4177_v22 = vrot.slane %v416_v21, %v420_v20  ;;  %v4193_v31 = vrot.slane %v416_v21, %v424_v28  ;;  %v381_v42 = vld [vmem:[%s4156_s13 + $0x18] sm:$0xff]  ;;  %s3996_s20 = smov 32   ;;  %s3997_s17 = smov 96   ;;  %vm1575_vm6 = vcmask 1040384  }
  0x48   : > { %487 = vmatprep.subr.bf16.mxu0 %v3729_v7  ;;  %v376_v50 = vld [vmem:[%s4163_s23 + $0x10] sm:$0xff]  ;;  %v377_v52 = vld [vmem:[%s4163_s23 + $0x18] sm:$0xff]  ;;  %s3998_s24 = smov 16   ;;  %s3999_s25 = smov 80  }
  0x49   : > { %s357_s21 = sand.u32 1, %s3975_s28   ;;  %s4002_s18 = smov [#allocation8]  }
  0x4a   : > { %s3181_s19 = sshll.u32 %s357_s21, 1 }
  0x4b   : > { %389 = vperm.xlu0 %3721, %v379_v2   ;;  %488 = vmatpush1.bf16.msra.mxu0 %v3731_v8  ;;  %s4481_s13 = scalar_lea.vmem [#allocation8], %s3181_s19  ;;  %s3919_s19 = sshll.u32 %s4002_s18, 4  ;;  %s3920_s19 = int_to_ptr.vmem [resolvable:$false] %s3919_s19 }
  0x4c   : > { %489 = vmatprep.subr.bf16.mxu0 %v3732_v9  ;;  %s3921_s26 = scalar_lea.vmem %s3920_s19, 64 }
  0x4f   : > { %490 = vmatpush1.bf16.msra.mxu0 %v3734_v10 }
  0xc2   : > { %v385_v11 = vpop.permute.xlu0 %384 }
  0xc3   : > { %v402_v15 = vmul.f32 %v385_v11, %v4166_v12 }
  0xc6   : > { %v390_v14 = vpop.permute.xlu0 %389 }
  0xc7   : > { %v403_v16 = vmul.f32 %v390_v14, %v4169_v13 }
  0xc9   : > { %v406_v17 = vpack.c.bf16 %v403_v16, %v402_v15 }
  0xcb   : > { %3194 = vmatmul.mubr.msk.bf16.vlgmr.msra.gmra.mxu0 %vm468_vm0, %v406_v17 }
  0xcc   : > { %517 = vmatprep.mubr.bf16.mxu0 %v3992_v0 }
 0x18b   : > { %v509_v23 = vpop.f32.mrf.mxu0 }
 0x18c   : > { %v4180_v24 = vadd.f32 %v509_v23, %v4177_v22 }
 0x18d   : > { %v511_v25 = vpop.f32.mrf.mxu0 }
 0x18e   : > { %3404 = vmatprep.mubr.msk.f32.mxu1 %vm568_vm1, %v4180_v24  ;;  %v4202_v34 = vadd.f32 %v511_v25, %v4193_v31 }
 0x18f   : > { %v513_v26 = vpop.f32.mrf.mxu0 }
 0x190   : > { %v4185_v27 = vadd.f32 %v513_v26, %v4177_v22 }
 0x191   : > { %v515_v30 = vpop.f32.mrf.mxu0 }
 0x192   : > { %566 = vrot.lane.b32.xlu1 %v4185_v27, %s3993_s10  ;;  %v4196_v33 = vadd.f32 %v515_v30, %v4193_v31 }
 0x196   : > { %564 = vrot.lane.b32.xlu1 %v4180_v24, %s3993_s10 }
 0x204   : > { %v567_v29 = vpop.permute.xlu1 %566 }
 0x205   : > { %3400 = vmatprep.subr.msk.mxu1 %vm568_vm1, %v567_v29 }
 0x206   : > { %3401 = vmatpush3.xpose.msk.msra.mxu1 %vm568_vm1, %v567_v29 }
 0x208   : > { %v565_v32 = vpop.permute.xlu1 %564 }
 0x209   : > { %3402 = vmatprep.subr.msk.mxu1 %vm568_vm1, %v565_v32 }
 0x20a   : > { %3403 = vmatpush3.xpose.msk.msra.mxu1 %vm568_vm1, %v565_v32 }
 0x20b   : > { %3407 = vmatprep.subr.mxu1 %v4196_v33 }
 0x20d   : > { %3405 = vmatmul.mubr.msk.f32.vlgmr.msra.gmra.mxu1 %vm568_vm1, %v4185_v27 }
 0x20e   : > { %3408 = vmatpush3.msra.mxu1 %v4196_v33 }
 0x20f   : > { %3409 = vmatprep.subr.mxu1 %v4202_v34 }
 0x210   : > { %3410 = vmatpush3.msra.mxu1 %v4202_v34 }
 0x2cd   : > { %v3406_v35 = vpop.f32.mrf.mxu1 }
 0x2ce   : > { %v653_v36 = vmul.f32 0.25, %v3406_v35 }
 0x2cf   : > { %v643_v37 = vpop.f32.mrf.mxu1 }
 0x2d0   : > { %v652_v38 = vmul.f32 0.25, %v643_v37  ;;  %v657_v39 = vsel %vm568_vm1, %v653_v36, -inf }
 0x2d1   : > { %658 = vmax.xlane.f32.xlu1 %v657_v39 }
 0x2d2   : > { %v654_v40 = vsel %vm568_vm1, %v652_v38, -inf }
 0x2d3   : > { %655 = vmax.xlane.f32.xlu0 %v654_v40 }
 0x2e2   : > { %394 = vperm.xlu1 %3722, %v380_v41  }
 0x2e6   : > { %763 = vrot.lane.b32.xlu1 %v4185_v27, %s3994_s22 }
 0x2e9   : > { %399 = vperm.xlu0 %3721, %v381_v42  }
 0x2ea   : > { %761 = vrot.lane.b32.xlu1 %v4180_v24, %s3994_s22 }
 0x2ee   : > { %757 = vrot.lane.b32.xlu1 %v4180_v24, %s3995_s12 }
 0x2f2   : > { %965 = vrot.lane.b32.xlu1 %v4180_v24, %s3996_s20 }
 0x2f6   : > { %963 = vrot.lane.b32.xlu1 %v4185_v27, %s3997_s17 }
 0x35a   : > { %v659_v43 = vpop.xlane.xlu1 %658 }
 0x35b   : > { %v661_v44 = vsub.f32 %v653_v36, %v659_v43 }
 0x35c   : > { %v656_v45 = vpop.xlane.xlu0 %655 }
 0x35d   : > { %v664_v46 = vmul.f32 1.442695, %v661_v44  ;;  %v660_v47 = vsub.f32 %v652_v38, %v656_v45 }
 0x35e   : > { %v395_v48 = vpop.permute.xlu1 %394 }
 0x35f   : > { %3751 = vpow2.f32 %v664_v46  ;;  %v662_v49 = vmul.f32 1.442695, %v660_v47  ;;  %v404_v53 = vmul.f32 %v395_v48, %v376_v50 }
 0x361   : > { %3753 = vpow2.f32 %v662_v49 }
 0x362   : > { %v764_v51 = vpop.permute.xlu1 %763 }
 0x363   : > { %3414 = vmatprep.subr.msk.mxu1 %vm568_vm1, %v764_v51 }
 0x364   : > { %v400_v54 = vpop.permute.xlu0 %399 }
 0x365   : > { %v405_v55 = vmul.f32 %v400_v54, %v377_v52 }
 0x366   : > { %v762_v61 = vpop.permute.xlu1 %761 }
 0x367   : > { %v407_v56 = vpack.c.bf16 %v405_v55, %v404_v53 }
 0x369   : > { %3195 = vmatmul.mubr.msk.bf16.gmra.mxu0 %vm468_vm0, %v407_v56 }
 0x36a   : > { %v758_v63 = vpop.permute.xlu1 %757 }
 0x36c   : > { %v3752_v57 = vpop.eup %3751 }
 0x36d   : > { %v669_v58 = vsel %vm568_vm1, %v3752_v57, 0.0 }
 0x36e   : > { %v3754_v59 = vpop.eup %3753  ;;  %670 = vadd.xlane.f32.xlu0 %v669_v58  ;;  %v966_v2 = vpop.permute.xlu1 %965 }
 0x36f   : > { %v666_v60 = vsel %vm568_vm1, %v3754_v59, 0.0 }
 0x372   : > { %667 = vadd.xlane.f32.xlu0 %v666_v60  ;;  %v964_v6 = vpop.permute.xlu1 %963 }
 0x388   : > { %967 = vrot.lane.b32.xlu0 %v4185_v27, %s3996_s20 }
 0x38c   : > { %759 = vrot.lane.b32.xlu0 %v4185_v27, %s3995_s12 }
 0x390   : > { %961 = vrot.lane.b32.xlu0 %v4180_v24, %s3997_s17 }
 0x3f7   : > { %v671_v62 = vpop.xlane.xlu0 %670 }
 0x3f8   : > { %3755 = vrcp.f32 %v671_v62 }
 0x3fb   : > { %v668_v0 = vpop.xlane.xlu0 %667 }
 0x3fc   : > { %3757 = vrcp.f32 %v668_v0 }
 0x3ff   : > { %v968_v1 = vpop.permute.xlu0 %967 }
 0x400   : > { %3428 = vmatprep.subr.msk.mxu0 %vm568_vm1, %v968_v1 }
 0x401   : > { %3429 = vmatpush3.xpose.msk.msra.mxu0 %vm568_vm1, %v968_v1 }
 0x402   : > { %3430 = vmatprep.subr.msk.mxu0 %vm568_vm1, %v966_v2 }
 0x403   : > { %v760_v3 = vpop.permute.xlu0 %759 }
 0x405   : > { %3431 = vmatpush3.xpose.msk.msra.mxu0 %vm568_vm1, %v966_v2  ;;  %v3756_v5 = vpop.eup %3755 }
 0x406   : > { %v675_v9 = vmul.f32 %v3756_v5, %v3752_v57 }
 0x407   : > { %v962_v4 = vpop.permute.xlu0 %961 }
 0x408   : > { %3432 = vmatprep.mubr.msk.f32.mxu0 %vm568_vm1, %v962_v4 }
 0x409   : > { %v3758_v7 = vpop.eup %3757  ;;  %3433 = vmatmul.mubr.msk.f32.vlgmr.msra.gmra.mxu0 %vm568_vm1, %v964_v6 }
 0x40a   : > { %v674_v8 = vmul.f32 %v3758_v7, %v3754_v59 }
 0x40c   : > { %3411 = vmatprep.mubr.msk.f32.mxu1 %vm568_vm1, %v674_v8 }
 0x40d   : > { %3412 = vmatmul.mubr.msk.f32.vlgmr.msra.gmra.mxu1 %vm568_vm1, %v675_v9 }
 0x40e   : > { %3415 = vmatpush3.xpose.msk.msra.mxu1 %vm568_vm1, %v764_v51  ;;  %3418 = vmatprep.mubr.msk.f32.mxu1 %vm568_vm1, %v758_v63 }
 0x40f   : > { %3416 = vmatprep.subr.msk.mxu1 %vm568_vm1, %v762_v61 }
 0x412   : > { %3417 = vmatpush3.xpose.msk.msra.mxu1 %vm568_vm1, %v762_v61 }
 0x415   : > { %3419 = vmatmul.mubr.msk.f32.vlgmr.msra.gmra.mxu1 %vm568_vm1, %v760_v3 }
 0x429   : > { %v4248_v10 = vpop.f32.mrf.mxu0 }
 0x42b   : > { %v4250_v11 = vpop.f32.mrf.mxu0 }
 0x42d   : > { %v4252_v14 = vpop.f32.mrf.mxu0 }
 0x42f   : > { %v4256_v16 = vpop.f32.mrf.mxu0 }
 0x4c9   : > { %v3434_v17 = vpop.f32.mrf.mxu0 }
 0x4ca   : > { %v1053_v30 = vmul.f32 0.25, %v3434_v17 }
 0x4cb   : > { %v1043_v21 = vpop.f32.mrf.mxu0 }
 0x4cc   : > { %v1052_v28 = vmul.f32 0.25, %v1043_v21  ;;  %v1057_v35 = vsel %vm568_vm1, %v1053_v30, -inf }
 0x4cd   : > { %v4254_v15 = vpop.f32.mrf.mxu1 }
 0x4ce   : > { %v1054_v32 = vsel %vm568_vm1, %v1052_v28, -inf }
 0x4cf   : > { %v4258_v18 = vpop.f32.mrf.mxu1 }
 0x4d5   : > { %v3420_v19 = vpop.f32.mrf.mxu1 }
 0x4d6   : > { %v849_v20 = vmul.f32 0.25, %v3420_v19 }
 0x4d7   : > { %v839_v23 = vpop.f32.mrf.mxu1 }
 0x4d8   : > { %v848_v25 = vmul.f32 0.25, %v839_v23  ;;  %v853_v26 = vsel %vm568_vm1, %v849_v20, -inf }
 0x4d9   : > { %854 = vmax.xlane.f32.xlu1 %v853_v26 }
 0x4da   : > { %v850_v29 = vsel %vm568_vm1, %v848_v25, -inf }
 0x4db   : > { %851 = vmax.xlane.f32.xlu0 %v850_v29 }
 0x4df   : > { %1055 = vmax.xlane.f32.xlu0 %v1054_v32 }
 0x4e3   : > { %1058 = vmax.xlane.f32.xlu0 %v1057_v35 }
 0x562   : > { %v855_v47 = vpop.xlane.xlu1 %854 }
 0x563   : > { %v857_v48 = vsub.f32 %v849_v20, %v855_v47 }
 0x564   : > { %v852_v36 = vpop.xlane.xlu0 %851 }
 0x565   : > { %v860_v49 = vmul.f32 1.442695, %v857_v48  ;;  %v856_v50 = vsub.f32 %v848_v25, %v852_v36 }
 0x567   : > { %v858_v51 = vmul.f32 1.442695, %v856_v50 }
 0x568   : > { %v1056_v37 = vpop.xlane.xlu0 %1055 }
 0x569   : > { %v1060_v38 = vsub.f32 %v1052_v28, %v1056_v37 }
 0x56b   : > { %v1062_v39 = vmul.f32 1.442695, %v1060_v38 }
 0x56c   : > { %v1059_v40 = vpop.xlane.xlu0 %1058 }
 0x56d   : > { %3759 = vpow2.f32 %v1062_v39  ;;  %v1061_v41 = vsub.f32 %v1053_v30, %v1059_v40 }
 0x56f   : > { %v1064_v42 = vmul.f32 1.442695, %v1061_v41 }
 0x571   : > { %3761 = vpow2.f32 %v1064_v42 }
 0x572   : > { %3763 = vpow2.f32 %v860_v49 }
 0x573   : > { %3765 = vpow2.f32 %v858_v51 }
 0x57a   : > { %v3760_v43 = vpop.eup %3759 }
 0x57b   : > { %v1066_v44 = vsel %vm568_vm1, %v3760_v43, 0.0 }
 0x57c   : > { %1067 = vadd.xlane.f32.xlu1 %v1066_v44 }
 0x57e   : > { %v3762_v45 = vpop.eup %3761 }
 0x57f   : > { %v1069_v46 = vsel %vm568_vm1, %v3762_v45, 0.0  ;;  %v3764_v52 = vpop.eup %3763 }
 0x580   : > { %1070 = vadd.xlane.f32.xlu0 %v1069_v46  ;;  %v865_v53 = vsel %vm568_vm1, %v3764_v52, 0.0  ;;  %v3766_v54 = vpop.eup %3765 }
 0x581   : > { %v862_v55 = vsel %vm568_vm1, %v3766_v54, 0.0 }
 0x58d   : > { %876 = vrot.lane.b32.xlu1 %v4196_v33, %s3995_s12 }
 0x591   : > { %1078 = vrot.lane.b32.xlu1 %v4196_v33, %s3997_s17 }
 0x595   : > { %1076 = vrot.lane.b32.xlu1 %v4202_v34, %s3997_s17 }
 0x596   : > { %874 = vrot.lane.b32.xlu0 %v4202_v34, %s3995_s12 }
 0x5b5   : > { %866 = vadd.xlane.f32.xlu0 %v865_v53 }
 0x5b9   : > { %863 = vadd.xlane.f32.xlu1 %v862_v55 }
 0x5ca   : > { %1167 = vrot.lane.b32.xlu1 %v4180_v24, %s3998_s24 }
 0x5cb   : > { %1169 = vrot.lane.b32.xlu0 %v4185_v27, %s3998_s24 }
 0x5ce   : > { %1165 = vrot.lane.b32.xlu1 %v4185_v27, %s3999_s25 }
 0x5cf   : > { %1163 = vrot.lane.b32.xlu0 %v4180_v24, %s3999_s25 }
 0x605   : > { %v1068_v56 = vpop.xlane.xlu1 %1067 }
 0x606   : > { %3767 = vrcp.f32 %v1068_v56 }
 0x609   : > { %v877_v57 = vpop.permute.xlu1 %876  ;;  %v1071_v58 = vpop.xlane.xlu0 %1070 }
 0x60a   : > { %3421 = vmatprep.subr.mxu1 %v877_v57 }
 0x60b   : > { %3422 = vmatpush3.msra.mxu1 %v877_v57 }
 0x60d   : > { %v875_v59 = vpop.permute.xlu0 %874  ;;  %v1079_v60 = vpop.permute.xlu1 %1078 }
 0x60e   : > { %3423 = vmatprep.subr.mxu1 %v875_v59 }
 0x60f   : > { %3424 = vmatpush3.msra.mxu1 %v875_v59 }
 0x610   : > { %3435 = vmatprep.subr.mxu1 %v1079_v60 }
 0x611   : > { %v1077_v61 = vpop.permute.xlu1 %1076 }
 0x613   : > { %v3768_v27 = vpop.eup %3767 }
 0x614   : > { %v1074_v5 = vmul.f32 %v3768_v27, %v3760_v43 }
 0x63e   : > { %v867_v62 = vpop.xlane.xlu0 %866 }
 0x63f   : > { %3769 = vrcp.f32 %v867_v62 }
 0x642   : > { %v864_v63 = vpop.xlane.xlu1 %863  ;;  %v1170_v2 = vpop.permute.xlu0 %1169 }
 0x643   : > { %3771 = vrcp.f32 %v864_v63 }
 0x644   : > { %3773 = vrcp.f32 %v1071_v58 }
 0x646   : > { %v1164_v7 = vpop.permute.xlu0 %1163  ;;  %v1168_v8 = vpop.permute.xlu1 %1167 }
 0x64a   : > { %v1166_v9 = vpop.permute.xlu1 %1165 }
 0x64c   : > { %v3770_v0 = vpop.eup %3769 }
 0x64d   : > { %v871_v3 = vmul.f32 %v3770_v0, %v3764_v52  ;;  %v4000_v52 = vmov 0.0  }
 0x650   : > { %v3772_v24 = vpop.eup %3771 }
 0x651   : > { %v870_v1 = vmul.f32 %v3772_v24, %v3766_v54  ;;  %v3774_v4 = vpop.eup %3773 }
 0x652   : > { %v1075_v6 = vmul.f32 %v3774_v4, %v3762_v45 }
 0x653   : > { %3425 = vmatprep.mubr.msk.f32.mxu1 %vm568_vm1, %v870_v1 }
 0x654   : > { %3426 = vmatmul.mubr.msk.f32.vlgmr.msra.gmra.mxu1 %vm568_vm1, %v871_v3 }
 0x655   : > { %3436 = vmatpush3.msra.mxu1 %v1079_v60  ;;  %3439 = vmatprep.mubr.msk.f32.mxu1 %vm568_vm1, %v1074_v5 }
 0x656   : > { %3437 = vmatprep.subr.mxu1 %v1077_v61 }
 0x657   : > { %3438 = vmatpush3.msra.mxu1 %v1077_v61 }
 0x658   : > { %3442 = vmatprep.subr.msk.mxu1 %vm568_vm1, %v1170_v2  ;;  %3440 = vmatmul.mubr.msk.f32.vlgmr.msra.gmra.mxu1 %vm568_vm1, %v1075_v6 }
 0x659   : > { %3443 = vmatpush3.xpose.msk.msra.mxu1 %vm568_vm1, %v1170_v2  ;;  %3446 = vmatprep.mubr.msk.f32.mxu1 %vm568_vm1, %v1164_v7 }
 0x65a   : > { %3444 = vmatprep.subr.msk.mxu1 %vm568_vm1, %v1168_v8 }
 0x65d   : > { %3445 = vmatpush3.xpose.msk.msra.mxu1 %vm568_vm1, %v1168_v8 }
 0x65e   : > { %3463 = vmatprep.subr.mxu1 %v4000_v52 }
 0x660   : > { %3447 = vmatmul.mubr.msk.f32.vlgmr.msra.gmra.mxu1 %vm568_vm1, %v1166_v9 }
 0x661   : > { %3464 = vmatpush3.msra.mxu1 %v4169_v13  ;;  %3467 = vmatprep.mubr.msk.f32.mxu1 %vm4001_vm2, %v4000_v52 }
 0x662   : > { %3465 = vmatprep.subr.mxu1 %v4000_v52 }
 0x663   : > { %3466 = vmatpush3.msra.mxu1 %v4166_v12 }
 0x664   : > { %3470 = vmatprep.subr.bf16.mxu1 %v4000_v52 }
 0x714   : > { %v3427_v17 = vpop.f32.mrf.mxu1 }
 0x716   : > { %v952_v19 = vpop.f32.mrf.mxu1 }
 0x718   : > { %v3441_v20 = vpop.f32.mrf.mxu1 }
 0x71a   : > { %v1154_v21 = vpop.f32.mrf.mxu1 }
 0x720   : > { %v3448_v23 = vpop.f32.mrf.mxu1 }
 0x721   : > { %v1255_v25 = vmul.f32 0.25, %v3448_v23 }
 0x722   : > { %v1245_v26 = vpop.f32.mrf.mxu1 }
 0x723   : > { %v1254_v28 = vmul.f32 0.25, %v1245_v26  ;;  %v1259_v29 = vsel %vm568_vm1, %v1255_v25, -inf  ;;  %v4371_v26 = vld [vmem:[#allocation7 + $0x28] sm:$0xff]  }
 0x724   : > { %1260 = vmax.xlane.f32.xlu1 %v1259_v29 }
 0x725   : > { %v1256_v30 = vsel %vm568_vm1, %v1254_v28, -inf }
 0x726   : > { %1257 = vmax.xlane.f32.xlu0 %v1256_v30 }
 0x735   : > { %1280 = vrot.lane.b32.xlu1 %v4196_v33, %s3999_s25 }
 0x739   : > { %1367 = vrot.lane.b32.xlu1 %v952_v19, %s3998_s24  ;;  %v4353_v19 = vadd.f32 %v4248_v10, %v4177_v22  ;;  %v4367_v10 = vld [vmem:[#allocation7 + $0x30] sm:$0xff]  }
 0x73d   : > { %1369 = vrot.lane.b32.xlu1 %v3427_v17, %s3998_s24  ;;  %v4345_v17 = vadd.f32 %v4252_v14, %v4177_v22  ;;  %v4364_v22 = vld [vmem:[#allocation7 + $0x38] sm:$0xff]  }
 0x741   : > { %1377 = vrot.lane.b32.xlu1 %v3441_v20, %s3996_s20 }
 0x7ad   : > { %v1261_v32 = vpop.xlane.xlu1 %1260 }
 0x7ae   : > { %v1263_v35 = vsub.f32 %v1255_v25, %v1261_v32  ;;  %v4380_v32 = vld [vmem:[#allocation5 + $0x18] sm:$0xff]  }
 0x7af   : > { %v1258_v36 = vpop.xlane.xlu0 %1257 }
 0x7b0   : > { %v1266_v37 = vmul.f32 1.442695, %v1263_v35  ;;  %v1262_v38 = vsub.f32 %v1254_v28, %v1258_v36  ;;  %v4375_v28 = vld [vmem:[#allocation7 + $0x20] sm:$0xff]   ;;  %v4384_v36 = vld [vmem:[#allocation5 + $0x10] sm:$0xff]  }
 0x7b1   : > { %v1281_v39 = vpop.permute.xlu1 %1280 }
 0x7b2   : > { %3775 = vpow2.f32 %v1266_v37  ;;  %v1264_v40 = vmul.f32 1.442695, %v1262_v38  ;;  %3449 = vmatprep.subr.mxu0 %v1281_v39  ;;  %v4390_v37 = vld [vmem:[#allocation5 + $0x8] sm:$0xff]  }
 0x7b3   : > { %3450 = vmatpush3.msra.mxu0 %v1281_v39  ;;  %v4395_v39 = vld [vmem:[#allocation5] sm:$0xff]  }
 0x7b4   : > { %3777 = vpow2.f32 %v1264_v40 }
 0x7b5   : > { %v1368_v53 = vpop.permute.xlu1 %1367 }
 0x7b6   : > { %v1389_v59 = vsel %vm568_vm1, %v4258_v18, %v1368_v53  ;;  %v4445_v53 = vadd.f32 %v4256_v16, %v4193_v31  ;;  %v4456_v16 = vadd.f32 %v4250_v11, %v4193_v31 }
 0x7b9   : > { %v1370_v54 = vpop.permute.xlu1 %1369 }
 0x7bd   : > { %v1378_v55 = vpop.permute.xlu1 %1377 }
 0x7bf   : > { %v3776_v41 = vpop.eup %3775 }
 0x7c0   : > { %v1271_v33 = vsel %vm568_vm1, %v3776_v41, 0.0 }
 0x7c1   : > { %v3778_v42 = vpop.eup %3777  ;;  %1272 = vadd.xlane.f32.xlu0 %v1271_v33 }
 0x7c2   : > { %v1268_v43 = vsel %vm568_vm1, %v3778_v42, 0.0 }
 0x7c5   : > { %1269 = vadd.xlane.f32.xlu0 %v1268_v43  ;;  %v4416_v43 = vld [vmem:[#allocation7] sm:$0xff]  }
 0x7db   : > { %1278 = vrot.lane.b32.xlu0 %v4202_v34, %s3999_s25 }
 0x7df   : > { %1375 = vrot.lane.b32.xlu0 %v1154_v21, %s3996_s20 }
 0x84a   : > { %v1273_v44 = vpop.xlane.xlu0 %1272 }
 0x84b   : > { %3779 = vrcp.f32 %v1273_v44 }
 0x84e   : > { %v1270_v45 = vpop.xlane.xlu0 %1269 }
 0x84f   : > { %3781 = vrcp.f32 %v1270_v45 }
 0x852   : > { %v1279_v46 = vpop.permute.xlu0 %1278 }
 0x853   : > { %3451 = vmatprep.subr.mxu0 %v1279_v46 }
 0x854   : > { %3452 = vmatpush3.msra.mxu0 %v1279_v46  ;;  %v4421_v46 = vld [vmem:[#allocation7 + $0x58] sm:$0xff]  }
 0x855   : > { %3456 = vmatprep.subr.mxu0 %v4000_v52 }
 0x856   : > { %v1376_v56 = vpop.permute.xlu0 %1375 }
 0x857   : > { %v1392_v61 = vsel %vm1391_vm3, %v1389_v59, %v1376_v56 }
 0x858   : > { %v3780_v47 = vpop.eup %3779 }
 0x859   : > { %v1277_v50 = vmul.f32 %v3780_v47, %v3776_v41  ;;  %v4401_v41 = vld [vmem:[#allocation7 + $0x18] sm:$0xff]  }
 0x85c   : > { %v3782_v48 = vpop.eup %3781 }
 0x85d   : > { %v1276_v49 = vmul.f32 %v3782_v48, %v3778_v42  ;;  %v4406_v42 = vld [vmem:[#allocation7 + $0x10] sm:$0xff]  }
 0x85f   : > { %3453 = vmatprep.mubr.msk.f32.mxu0 %vm568_vm1, %v1276_v49  ;;  %v4425_v49 = vld [vmem:[#allocation7 + $0x50] sm:$0xff]  }
 0x860   : > { %3454 = vmatmul.mubr.msk.f32.vlgmr.msra.gmra.mxu0 %vm568_vm1, %v1277_v50  ;;  %v4431_v50 = vld [vmem:[#allocation7 + $0x48] sm:$0xff]  }
 0x861   : > { %3460 = vmatprep.mubr.msk.f32.mxu0 %vm4001_vm2, %v4000_v52  ;;  %3457 = vmatpush3.xpose.msk.msra.mxu0 %vm468_vm0, %v4169_v13  ;;  %v1390_v13 = vsel %vm568_vm1, %v4254_v15, %v1370_v54 }
 0x862   : > { %3458 = vmatprep.subr.mxu0 %v4000_v52  ;;  %v1393_v57 = vsel %vm1391_vm3, %v1390_v13, %v1378_v55 }
 0x865   : > { %3459 = vmatpush3.xpose.msk.msra.mxu0 %vm468_vm0, %v4166_v12 }
 0x866   : > { %3482 = vmatprep.subr.bf16.mxu0 %v4000_v52 }
 0x920   : > { %v3455_v51 = vpop.f32.mrf.mxu0 }
 0x921   : > { %1385 = vrot.lane.b32.xlu1 %v3455_v51, %s3994_s22  ;;  %v4435_v51 = vld [vmem:[#allocation7 + $0x40] sm:$0xff]  }
 0x922   : > { %v1356_v34 = vpop.f32.mrf.mxu0 }
 0x923   : > { %1383 = vrot.lane.b32.xlu0 %v1356_v34, %s3994_s22  ;;  %v4441_v34 = vld [vmem:[%s4701_s5] ss:$0 sm:$0xff] }
 0x993   : > { %v1386_v58 = vpop.permute.xlu1 %1385 }
 0x994   : > { %v1396_v60 = vsel %vm1394_vm4, %v1393_v57, %v1386_v58 }
 0x995   : > { %3783 = vtanh.f32 %v1396_v60  ;;  %v1384_v62 = vpop.permute.xlu0 %1383 }
 0x996   : > { %v1395_v63 = vsel %vm1394_vm4, %v1392_v61, %v1384_v62 }
 0x997   : > { %3785 = vtanh.f32 %v1395_v63 }
 0x9a2   : > { %v3784_v27 = vpop.eup %3783 }
 0x9a3   : > { %v1400_v15 = vsel %vm468_vm0, %v3784_v27, 0.0 }
 0x9a4   : > { %v4334_v0 = vpop.eup %3785 }
 0x9a5   : > { %v1399_v24 = vsel %vm468_vm0, %v4334_v0, 0.0  ;;  %v1573_v38 = vrot.slane %v4334_v0, 7 }
 0x9a6   : > { %v1401_v1 = vadd.f32 %v1400_v15, %v1399_v24 }
 0x9a7   : > { %v1576_v40 = vsel %vm1575_vm6, %v4166_v12, %v1573_v38  ;;  %v4412_v12 = vld [vmem:[#allocation7 + $0x8] sm:$0xff]  }
 0x9a8   : > { %v1402_v2 = vrot.slane %v1401_v1, 4  ;;  %v1577_v33 = vpack.c.bf16 %v1576_v40, %v1576_v40 }
 0x9aa   : > { %v1403_v18 = vadd.f32 %v1402_v2, %v1401_v1 }
 0x9ac   : > { %v1404_v3 = vrot.slane %v1403_v18, 2 }
 0x9ae   : > { %v1405_v4 = vadd.f32 %v1404_v3, %v1403_v18  ;;  %v4478_v3 = vld [vmem:[%s4703_s7] sm:$0x1] }
 0x9b0   : > { %v1406_v5 = vrot.slane %v1405_v4, 1 }
 0x9b2   : > { %v1407_v6 = vadd.f32 %v1406_v5, %v1405_v4 }
 0x9b4   : > { %3461 = vmatmul.mubr.msk.f32.vlgmr.msra.gmra.mxu0 %vm468_vm0, %v1407_v6 }
 0x9b5   : > { %3490 = vmatprep.mubr.msk.bf16.mxu0 %vm4001_vm2, %v4000_v52  ;;  %3483 = vmatpush3.bf16.msra.mxu0 %v4364_v22 }
 0x9b6   : > { %3484 = vmatprep.subr.bf16.mxu0 %v4000_v52 }
 0x9b9   : > { %3485 = vmatpush3.bf16.msra.mxu0 %v4367_v10 }
 0x9ba   : > { %3486 = vmatprep.subr.bf16.mxu0 %v4000_v52 }
 0x9bd   : > { %3487 = vmatpush3.bf16.msra.mxu0 %v4371_v26 }
 0x9be   : > { %3488 = vmatprep.subr.bf16.mxu0 %v4000_v52 }
 0x9c1   : > { %3489 = vmatpush3.bf16.msra.mxu0 %v4375_v28 }
 0x9c2   : > { %3506 = vmatprep.subr.bf16.mxu0 %v4000_v52 }
 0xa74   : > { %v1483_v7 = vpop.f32.mrf.mxu0 }
 0xa75   : > { %v1488_v8 = vsel %vm1487_vm5, %v1483_v7, -inf }
 0xa76   : > { %1489 = vmax.xlane.f32.xlu0 %v1488_v8  ;;  %v3462_v9 = vpop.f32.mrf.mxu0 }
 0xa8c   : > { %1864 = vrot.lane.b32.xlu0 %v4345_v17, %s3993_s10 }
 0xa90   : > { %2060 = vrot.lane.b32.xlu0 %v4345_v17, %s3994_s22 }
 0xa94   : > { %2054 = vrot.lane.b32.xlu0 %v4353_v19, %s3995_s12 }
 0xaff   : > { %v1490_v20 = vpop.xlane.xlu0 %1489 }
 0xb00   : > { %v1491_v21 = vsub.f32 %v1483_v7, %v1490_v20 }
 0xb02   : > { %v1492_v23 = vmul.f32 1.442695, %v1491_v21 }
 0xb03   : > { %v1865_v44 = vpop.permute.xlu0 %1864 }
 0xb04   : > { %3787 = vpow2.f32 %v1492_v23 }
 0xb07   : > { %v2061_v62 = vpop.permute.xlu0 %2060 }
 0xb0b   : > { %v2055_v63 = vpop.permute.xlu0 %2054 }
 0xb11   : > { %v3788_v25 = vpop.eup %3787 }
 0xb12   : > { %v1494_v14 = vsel %vm1487_vm5, %v3788_v25, 0.0 }
 0xb13   : > { %1495 = vadd.xlane.f32.xlu1 %v1494_v14 }
 0xb24   : > { %1862 = vrot.lane.b32.xlu1 %v4353_v19, %s3993_s10 }
 0xb28   : > { %2058 = vrot.lane.b32.xlu1 %v4353_v19, %s3994_s22 }
 0xb2c   : > { %2056 = vrot.lane.b32.xlu1 %v4345_v17, %s3995_s12 }
 0xb9c   : > { %v1496_v29 = vpop.xlane.xlu1 %1495 }
 0xb9d   : > { %3789 = vrcp.f32 %v1496_v29 }
 0xba0   : > { %v1863_v61 = vpop.permute.xlu1 %1862 }
 0xba4   : > { %v2059_v31 = vpop.permute.xlu1 %2058 }
 0xba8   : > { %v2057_v11 = vpop.permute.xlu1 %2056 }
 0xbaa   : > { %v3790_v30 = vpop.eup %3789 }
 0xbab   : > { %v1498_v35 = vmul.f32 %v3790_v30, %v3788_v25 }
 0xbad   : > { %3468 = vmatmul.mubr.msk.f32.vlgmr.msra.gmra.mxu1 %vm568_vm1, %v1498_v35 }
 0xbae   : > { %3471 = vmatpush3.bf16.msra.mxu1 %v4380_v32  ;;  %3478 = vmatprep.mubr.msk.bf16.mxu1 %vm4001_vm2, %v4000_v52 }
 0xbaf   : > { %3472 = vmatprep.subr.bf16.mxu1 %v4000_v52 }
 0xbb2   : > { %3473 = vmatpush3.bf16.msra.mxu1 %v4384_v36 }
 0xbb3   : > { %3474 = vmatprep.subr.bf16.mxu1 %v4000_v52 }
 0xbb6   : > { %3475 = vmatpush3.bf16.msra.mxu1 %v4390_v37 }
 0xbb7   : > { %3476 = vmatprep.subr.bf16.mxu1 %v4000_v52 }
 0xbba   : > { %3477 = vmatpush3.bf16.msra.mxu1 %v4395_v39 }
 0xbbb   : > { %3494 = vmatprep.subr.bf16.mxu1 %v4000_v52 }
 0xbbd   : > { %3479 = vmatmul.mubr.msk.bf16.vlgmr.msra.gmra.mxu1 %vm468_vm0, %v1577_v33 }
 0xbbe   : > { %3495 = vmatpush3.bf16.msra.mxu1 %v4401_v41  ;;  %3502 = vmatprep.mubr.msk.bf16.mxu1 %vm4001_vm2, %v4000_v52 }
 0xbbf   : > { %3496 = vmatprep.subr.bf16.mxu1 %v4000_v52 }
 0xbc2   : > { %3497 = vmatpush3.bf16.msra.mxu1 %v4406_v42 }
 0xbc3   : > { %3498 = vmatprep.subr.bf16.mxu1 %v4000_v52 }
 0xbc6   : > { %3499 = vmatpush3.bf16.msra.mxu1 %v4412_v12 }
 0xbc7   : > { %3500 = vmatprep.subr.bf16.mxu1 %v4000_v52 }
 0xbca   : > { %3501 = vmatpush3.bf16.msra.mxu1 %v4416_v43 }
 0xbcb   : > { %3518 = vmatprep.subr.msk.mxu1 %vm568_vm1, %v1865_v44 }
 0xc6d   : > { %v1568_v45 = vpop.f32.mrf.mxu1 }
 0xc6e   : > { %v1653_v47 = vpack.c.bf16 %v1568_v45, %v1568_v45 }
 0xc6f   : > { %v3469_v48 = vpop.f32.mrf.mxu1 }
 0xc70   : > { %3491 = vmatmul.mubr.msk.bf16.vlgmr.msra.gmra.mxu0 %vm468_vm0, %v1653_v47 }
 0xc71   : > { %3507 = vmatpush3.bf16.msra.mxu0 %v4421_v46  ;;  %3514 = vmatprep.mubr.msk.bf16.mxu0 %vm4001_vm2, %v4000_v52 }
 0xc72   : > { %3508 = vmatprep.subr.bf16.mxu0 %v4000_v52 }
 0xc75   : > { %3509 = vmatpush3.bf16.msra.mxu0 %v4425_v49 }
 0xc76   : > { %3510 = vmatprep.subr.bf16.mxu0 %v4000_v52 }
 0xc79   : > { %3511 = vmatpush3.bf16.msra.mxu0 %v4431_v50 }
 0xc7a   : > { %3512 = vmatprep.subr.bf16.mxu0 %v4000_v52 }
 0xc7d   : > { %v1645_v54 = vpop.f32.mrf.mxu1  ;;  %3513 = vmatpush3.bf16.msra.mxu0 %v4435_v51 }
 0xc7e   : > { %v1646_v55 = vadd.f32 %v4441_v34, %v1645_v54  ;;  %3525 = vmatprep.subr.mxu0 %v4445_v53 }
 0xc7f   : > { %v3480_v56 = vpop.f32.mrf.mxu1 }
 0xc80   : > { %3791 = vtanh.f32 %v1646_v55 }
 0xc81   : > { %v1648_v13 = vpop.f32.mrf.mxu1 }
 0xc83   : > { %v3481_v57 = vpop.f32.mrf.mxu1 }
 0xc8d   : > { %v3792_v58 = vpop.eup %3791 }
 0xc8e   : > { %v1652_v59 = vpack.c.bf16 %v3792_v58, %v3792_v58 }
 0xc90   : > { %v1788_v60 = vshrl.u32 %v1652_v59, 16  ;;  %3503 = vmatmul.mubr.msk.bf16.vlgmr.msra.gmra.mxu1 %vm468_vm0, %v1652_v59 }
 0xc91   : > { %3519 = vmatpush3.xpose.msk.msra.mxu1 %vm568_vm1, %v1865_v44  ;;  %3522 = vmatprep.mubr.msk.f32.mxu1 %vm568_vm1, %v4353_v19 }
 0xc92   : > { %3520 = vmatprep.subr.msk.mxu1 %vm568_vm1, %v1863_v61  ;;  %3515 = vmatmul.mubr.msk.bf16.vlgmr.msra.gmra.mxu0 %vm468_vm0, %v1788_v60 }
 0xc93   : > { %3526 = vmatpush3.msra.mxu0 %v4445_v53 }
 0xc94   : > { %3527 = vmatprep.subr.mxu0 %v4456_v16 }
 0xc95   : > { %3521 = vmatpush3.xpose.msk.msra.mxu1 %vm568_vm1, %v1863_v61  ;;  %3528 = vmatpush3.msra.mxu0 %v4456_v16 }
 0xc96   : > { %3532 = vmatprep.subr.msk.mxu1 %vm568_vm1, %v2061_v62 }
 0xc98   : > { %3523 = vmatmul.mubr.msk.f32.vlgmr.msra.gmra.mxu1 %vm568_vm1, %v4345_v17 }
 0xc99   : > { %3533 = vmatpush3.xpose.msk.msra.mxu1 %vm568_vm1, %v2061_v62  ;;  %3536 = vmatprep.mubr.msk.f32.mxu1 %vm568_vm1, %v2055_v63 }
 0xc9a   : > { %3534 = vmatprep.subr.msk.mxu1 %vm568_vm1, %v2059_v31 }
 0xc9d   : > { %3535 = vmatpush3.xpose.msk.msra.mxu1 %vm568_vm1, %v2059_v31 }
 0xca0   : > { %3537 = vmatmul.mubr.msk.f32.vlgmr.msra.gmra.mxu1 %vm568_vm1, %v2057_v11 }
 0xd30   : > { %v1715_v27 = vpop.f32.mrf.mxu0 }
 0xd32   : > { %v3492_v0 = vpop.f32.mrf.mxu0 }
 0xd34   : > { %v1718_v15 = vpop.f32.mrf.mxu0 }
 0xd36   : > { %v3493_v24 = vpop.f32.mrf.mxu0 }
 0xd50   : > { %v1782_v1 = vpop.f32.mrf.mxu1 }
 0xd51   : > { %v1783_v2 = vadd.f32 %v1782_v1, %v1715_v27 }
 0xd52   : > { %v3504_v18 = vpop.f32.mrf.mxu1  ;;  %v1851_v4 = vpop.f32.mrf.mxu0 }
 0xd53   : > { %v1857_v5 = vadd.f32 %v1851_v4, %v1783_v2 }
 0xd54   : > { %v1785_v6 = vpop.f32.mrf.mxu1  ;;  %v3516_v7 = vpop.f32.mrf.mxu0 }
 0xd55   : > { %v1858_v8 = vadd.f32 %v1857_v5, %v4478_v3 }
 0xd56   : > { %v3505_v9 = vpop.f32.mrf.mxu1  ;;  %v1854_v20 = vpop.f32.mrf.mxu0 }
 0xd57   : > { %1859 = vst [vmem:[%s4481_s13] sm:$0x1] %v1858_v8 }
 0xd58   : > { %v3517_v21 = vpop.f32.mrf.mxu0  ;;  %v3524_v23 = vpop.f32.mrf.mxu1 }
 0xd59   : > { %v1950_v25 = vmul.f32 0.25, %v3524_v23 }
 0xd5a   : > { %v1940_v14 = vpop.f32.mrf.mxu1 }
 0xd5b   : > { %v1949_v29 = vmul.f32 0.25, %v1940_v14  ;;  %v1954_v30 = vsel %vm568_vm1, %v1950_v25, -inf }
 0xd5c   : > { %1955 = vmax.xlane.f32.xlu1 %v1954_v30 }
 0xd5d   : > { %v1951_v35 = vsel %vm568_vm1, %v1949_v29, -inf }
 0xd5e   : > { %1952 = vmax.xlane.f32.xlu0 %v1951_v35 }
 0xd60   : > { %v3538_v38 = vpop.f32.mrf.mxu1 }
 0xd61   : > { %v2146_v44 = vmul.f32 0.25, %v3538_v38 }
 0xd62   : > { %v2136_v40 = vpop.f32.mrf.mxu1 }
 0xd63   : > { %v2145_v33 = vmul.f32 0.25, %v2136_v40  ;;  %v2150_v47 = vsel %vm568_vm1, %v2146_v44, -inf }
 0xd65   : > { %v2147_v45 = vsel %vm568_vm1, %v2145_v33, -inf }
 0xd66   : > { %2148 = vmax.xlane.f32.xlu0 %v2147_v45 }
 0xd6a   : > { %2151 = vmax.xlane.f32.xlu0 %v2150_v47 }
 0xd6d   : > { %2173 = vrot.lane.b32.xlu1 %v4445_v53, %s3995_s12 }
 0xde5   : > { %v1956_v48 = vpop.xlane.xlu1 %1955 }
 0xde6   : > { %v1958_v54 = vsub.f32 %v1950_v25, %v1956_v48 }
 0xde7   : > { %v1953_v55 = vpop.xlane.xlu0 %1952 }
 0xde8   : > { %v1961_v56 = vmul.f32 1.442695, %v1958_v54  ;;  %v1957_v13 = vsub.f32 %v1949_v29, %v1953_v55 }
 0xde9   : > { %v2174_v57 = vpop.permute.xlu1 %2173 }
 0xdea   : > { %3793 = vpow2.f32 %v1961_v56  ;;  %v1959_v58 = vmul.f32 1.442695, %v1957_v13  ;;  %3539 = vmatprep.subr.mxu0 %v2174_v57 }
 0xdec   : > { %3795 = vpow2.f32 %v1959_v58 }
 0xdef   : > { %v2149_v59 = vpop.xlane.xlu0 %2148 }
 0xdf0   : > { %v2153_v24 = vsub.f32 %v2145_v33, %v2149_v59 }
 0xdf2   : > { %v2155_v1 = vmul.f32 1.442695, %v2153_v24 }
 0xdf3   : > { %v2152_v60 = vpop.xlane.xlu0 %2151 }
 0xdf4   : > { %v2154_v61 = vsub.f32 %v2146_v44, %v2152_v60 }
 0xdf6   : > { %v2157_v62 = vmul.f32 1.442695, %v2154_v61 }
 0xdf7   : > { %v3794_v63 = vpop.eup %3793 }
 0xdf8   : > { %3797 = vpow2.f32 %v2157_v62  ;;  %v1966_v31 = vsel %vm568_vm1, %v3794_v63, 0.0 }
 0xdf9   : > { %v3796_v11 = vpop.eup %3795  ;;  %1967 = vadd.xlane.f32.xlu0 %v1966_v31  ;;  %3799 = vpow2.f32 %v2155_v1 }
 0xdfa   : > { %v1963_v27 = vsel %vm568_vm1, %v3796_v11, 0.0 }
 0xdfb   : > { %1964 = vadd.xlane.f32.xlu1 %v1963_v27 }
 0xe05   : > { %v3798_v0 = vpop.eup %3797 }
 0xe06   : > { %v2162_v15 = vsel %vm568_vm1, %v3798_v0, 0.0  ;;  %v3800_v2 = vpop.eup %3799 }
 0xe07   : > { %2163 = vadd.xlane.f32.xlu0 %v2162_v15  ;;  %v2159_v18 = vsel %vm568_vm1, %v3800_v2, 0.0 }
 0xe0c   : > { %2264 = vrot.lane.b32.xlu1 %v4345_v17, %s3996_s20 }
 0xe10   : > { %2262 = vrot.lane.b32.xlu1 %v4353_v19, %s3996_s20 }
 0xe1d   : > { %2171 = vrot.lane.b32.xlu0 %v4456_v16, %s3995_s12 }
 0xe21   : > { %2258 = vrot.lane.b32.xlu0 %v4353_v19, %s3997_s17 }
 0xe34   : > { %2160 = vadd.xlane.f32.xlu1 %v2159_v18 }
 0xe45   : > { %2260 = vrot.lane.b32.xlu1 %v4345_v17, %s3997_s17 }
 0xe82   : > { %v1968_v4 = vpop.xlane.xlu0 %1967 }
 0xe83   : > { %3801 = vrcp.f32 %v1968_v4 }
 0xe84   : > { %v1965_v5 = vpop.xlane.xlu1 %1964 }
 0xe85   : > { %3803 = vrcp.f32 %v1965_v5 }
 0xe88   : > { %v2265_v23 = vpop.permute.xlu1 %2264 }
 0xe8c   : > { %v2263_v25 = vpop.permute.xlu1 %2262 }
 0xe90   : > { %v3802_v6 = vpop.eup %3801  ;;  %v2164_v7 = vpop.xlane.xlu0 %2163 }
 0xe91   : > { %v1972_v20 = vmul.f32 %v3802_v6, %v3794_v63  ;;  %3805 = vrcp.f32 %v2164_v7 }
 0xe92   : > { %v3804_v8 = vpop.eup %3803 }
 0xe93   : > { %v1971_v9 = vmul.f32 %v3804_v8, %v3796_v11 }
 0xe94   : > { %v2172_v21 = vpop.permute.xlu0 %2171 }
 0xe95   : > { %3529 = vmatprep.mubr.msk.f32.mxu0 %vm568_vm1, %v1971_v9 }
 0xe96   : > { %3530 = vmatmul.mubr.msk.f32.vlgmr.msra.gmra.mxu0 %vm568_vm1, %v1972_v20  ;;  %v3835_v20 = vld [vmem:[%s4163_s23 + $0x18] sm:$0xff] }
 0xe97   : > { %3540 = vmatpush3.msra.mxu0 %v2174_v57 }
 0xe98   : > { %3541 = vmatprep.subr.mxu0 %v2172_v21  ;;  %v2259_v40 = vpop.permute.xlu0 %2258 }
 0xe99   : > { %3542 = vmatpush3.msra.mxu0 %v2172_v21  ;;  %v4552_v21 = vld [vmem:[%s4163_s23 + $0x10] sm:$0xff]  ;;  %s3066_s23 = sshll.u32 %s4481_s13, 4  ;;  %s4643_s23 = int_to_ptr.vmem [resolvable:$true] %s3066_s23 }
 0xe9a   : > { %3546 = vmatprep.subr.msk.mxu0 %vm568_vm1, %v2265_v23  ;;  %p3922_p7 = scmp.lt.s32.totalorder %s4643_s23, %s3920_s19 }
 0xe9e   : > { %v3806_v29 = vpop.eup %3805 }
 0xe9f   : > { %v2168_v38 = vmul.f32 %v3806_v29, %v3798_v0 }
 0xebd   : > { %v2161_v14 = vpop.xlane.xlu1 %2160 }
 0xebe   : > { %3807 = vrcp.f32 %v2161_v14 }
 0xec1   : > { %v2261_v33 = vpop.permute.xlu1 %2260 }
 0xecb   : > { %v3808_v30 = vpop.eup %3807 }
 0xecc   : > { %v2167_v35 = vmul.f32 %v3808_v30, %v3800_v2 }
 0xece   : > { %3543 = vmatprep.mubr.msk.f32.mxu0 %vm568_vm1, %v2167_v35 }
 0xecf   : > { %3544 = vmatmul.mubr.msk.f32.vlgmr.msra.gmra.mxu0 %vm568_vm1, %v2168_v38 }
 0xed0   : > { %3547 = vmatpush3.xpose.msk.msra.mxu0 %vm568_vm1, %v2265_v23  ;;  %3550 = vmatprep.mubr.msk.f32.mxu0 %vm568_vm1, %v2259_v40 }
 0xed1   : > { %3548 = vmatprep.subr.msk.mxu0 %vm568_vm1, %v2263_v25 }
 0xed4   : > { %3549 = vmatpush3.xpose.msk.msra.mxu0 %vm568_vm1, %v2263_v25 }
 0xed7   : > { %3551 = vmatmul.mubr.msk.f32.vlgmr.msra.gmra.mxu0 %vm568_vm1, %v2261_v33 }
 0xf56   : > { %v4514_v44 = vpop.f32.mrf.mxu0 }
 0xf58   : > { %v4516_v45 = vpop.f32.mrf.mxu0 }
 0xf8f   : > { %v4518_v47 = vpop.f32.mrf.mxu0 }
 0xf91   : > { %v4520_v48 = vpop.f32.mrf.mxu0 }
 0xf97   : > { %v3552_v54 = vpop.f32.mrf.mxu0 }
 0xf98   : > { %v2350_v55 = vmul.f32 0.25, %v3552_v54 }
 0xf99   : > { %v2340_v56 = vpop.f32.mrf.mxu0 }
 0xf9a   : > { %v2349_v13 = vmul.f32 0.25, %v2340_v56  ;;  %v2354_v57 = vsel %vm568_vm1, %v2350_v55, -inf }
 0xf9b   : > { %2355 = vmax.xlane.f32.xlu1 %v2354_v57 }
 0xf9c   : > { %v2351_v58 = vsel %vm568_vm1, %v2349_v13, -inf }
 0xf9d   : > { %2352 = vmax.xlane.f32.xlu0 %v2351_v58 }
 0xfac   : > { %2375 = vrot.lane.b32.xlu1 %v4445_v53, %s3997_s17 }
 0xfb0   : > { %2466 = vrot.lane.b32.xlu1 %v4345_v17, %s3998_s24 }
 0xfb4   : > { %2464 = vrot.lane.b32.xlu1 %v4353_v19, %s3998_s24 }
 0xfb8   : > { %2462 = vrot.lane.b32.xlu1 %v4345_v17, %s3999_s25 }
0x1024   : > { %v2356_v59 = vpop.xlane.xlu1 %2355 }
0x1025   : > { %v2358_v60 = vsub.f32 %v2350_v55, %v2356_v59 }
0x1026   : > { %v2353_v61 = vpop.xlane.xlu0 %2352 }
0x1027   : > { %v2361_v62 = vmul.f32 1.442695, %v2358_v60  ;;  %v2357_v63 = vsub.f32 %v2349_v13, %v2353_v61 }
0x1028   : > { %v2376_v31 = vpop.permute.xlu1 %2375 }
0x1029   : > { %3809 = vpow2.f32 %v2361_v62  ;;  %v2359_v11 = vmul.f32 1.442695, %v2357_v63  ;;  %3553 = vmatprep.subr.mxu1 %v2376_v31 }
0x102a   : > { %3554 = vmatpush3.msra.mxu1 %v2376_v31 }
0x102b   : > { %3811 = vpow2.f32 %v2359_v11 }
0x102c   : > { %v2467_v18 = vpop.permute.xlu1 %2466 }
0x1036   : > { %v3810_v27 = vpop.eup %3809 }
0x1037   : > { %v2366_v0 = vsel %vm568_vm1, %v3810_v27, 0.0 }
0x1038   : > { %v3812_v15 = vpop.eup %3811  ;;  %2367 = vadd.xlane.f32.xlu0 %v2366_v0 }
0x1039   : > { %v2363_v24 = vsel %vm568_vm1, %v3812_v15, 0.0 }
0x103c   : > { %2364 = vadd.xlane.f32.xlu0 %v2363_v24 }
0x1052   : > { %2373 = vrot.lane.b32.xlu0 %v4456_v16, %s3997_s17 }
0x1056   : > { %2460 = vrot.lane.b32.xlu0 %v4353_v19, %s3999_s25  ;;  %v2465_v19 = vpop.permute.xlu1 %2464 }
0x105a   : > { %v2463_v9 = vpop.permute.xlu1 %2462 }
0x10c1   : > { %v2368_v17 = vpop.xlane.xlu0 %2367 }
0x10c2   : > { %3813 = vrcp.f32 %v2368_v17 }
0x10c5   : > { %v2365_v1 = vpop.xlane.xlu0 %2364 }
0x10c6   : > { %3815 = vrcp.f32 %v2365_v1 }
0x10c9   : > { %v2374_v2 = vpop.permute.xlu0 %2373 }
0x10ca   : > { %3555 = vmatprep.subr.mxu1 %v2374_v2 }
0x10cb   : > { %3556 = vmatpush3.msra.mxu1 %v2374_v2 }
0x10cc   : > { %3560 = vmatprep.subr.msk.mxu1 %vm568_vm1, %v2467_v18 }
0x10cd   : > { %v2461_v8 = vpop.permute.xlu0 %2460 }
0x10cf   : > { %v3814_v4 = vpop.eup %3813 }
0x10d0   : > { %v2372_v7 = vmul.f32 %v3814_v4, %v3810_v27 }
0x10d3   : > { %v3816_v5 = vpop.eup %3815 }
0x10d4   : > { %v2371_v6 = vmul.f32 %v3816_v5, %v3812_v15 }
0x10d6   : > { %3557 = vmatprep.mubr.msk.f32.mxu1 %vm568_vm1, %v2371_v6 }
0x10d7   : > { %3558 = vmatmul.mubr.msk.f32.vlgmr.msra.gmra.mxu1 %vm568_vm1, %v2372_v7 }
0x10d8   : > { %3561 = vmatpush3.xpose.msk.msra.mxu1 %vm568_vm1, %v2467_v18  ;;  %3564 = vmatprep.mubr.msk.f32.mxu1 %vm568_vm1, %v2461_v8 }
0x10d9   : > { %3562 = vmatprep.subr.msk.mxu1 %vm568_vm1, %v2465_v19 }
0x10dc   : > { %3563 = vmatpush3.xpose.msk.msra.mxu1 %vm568_vm1, %v2465_v19 }
0x10dd   : > { %3581 = vmatprep.subr.mxu1 %v4000_v52 }
0x10df   : > { %3565 = vmatmul.mubr.msk.f32.vlgmr.msra.gmra.mxu1 %vm568_vm1, %v2463_v9 }
0x10e0   : > { %3582 = vmatpush3.msra.mxu1 %v3835_v20  ;;  %3585 = vmatprep.mubr.msk.f32.mxu1 %vm4001_vm2, %v4000_v52 }
0x10e1   : > { %3583 = vmatprep.subr.mxu1 %v4000_v52 }
0x10e2   : > { %3584 = vmatpush3.msra.mxu1 %v4552_v21 }
0x10e3   : > { %3588 = vmatprep.subr.bf16.mxu1 %v4000_v52 }
0x1197   : > { %v3559_v23 = vpop.f32.mrf.mxu1 }
0x1199   : > { %v2451_v25 = vpop.f32.mrf.mxu1 }
0x119f   : > { %v3566_v14 = vpop.f32.mrf.mxu1 }
0x11a0   : > { %v2552_v29 = vmul.f32 0.25, %v3566_v14 }
0x11a1   : > { %v2542_v30 = vpop.f32.mrf.mxu1 }
0x11a2   : > { %v2551_v35 = vmul.f32 0.25, %v2542_v30  ;;  %v2556_v38 = vsel %vm568_vm1, %v2552_v29, -inf }
0x11a3   : > { %2557 = vmax.xlane.f32.xlu1 %v2556_v38 }
0x11a4   : > { %v2553_v40 = vsel %vm568_vm1, %v2551_v35, -inf }
0x11a5   : > { %2554 = vmax.xlane.f32.xlu0 %v2553_v40 }
0x11b4   : > { %2577 = vrot.lane.b32.xlu1 %v4445_v53, %s3999_s25 }
0x11b8   : > { %2664 = vrot.lane.b32.xlu1 %v4520_v48, %s3998_s24 }
0x11bc   : > { %2666 = vrot.lane.b32.xlu1 %v4518_v47, %s3998_s24 }
0x11c0   : > { %2674 = vrot.lane.b32.xlu1 %v3559_v23, %s3996_s20 }
0x122c   : > { %v2558_v33 = vpop.xlane.xlu1 %2557 }
0x122d   : > { %v2560_v54 = vsub.f32 %v2552_v29, %v2558_v33 }
0x122e   : > { %v2555_v55 = vpop.xlane.xlu0 %2554 }
0x122f   : > { %v2563_v56 = vmul.f32 1.442695, %v2560_v54  ;;  %v2559_v13 = vsub.f32 %v2551_v35, %v2555_v55 }
0x1230   : > { %v2578_v57 = vpop.permute.xlu1 %2577 }
0x1231   : > { %3817 = vpow2.f32 %v2563_v56  ;;  %v2561_v58 = vmul.f32 1.442695, %v2559_v13  ;;  %3567 = vmatprep.subr.mxu0 %v2578_v57 }
0x1232   : > { %3568 = vmatpush3.msra.mxu0 %v2578_v57 }
0x1233   : > { %3819 = vpow2.f32 %v2561_v58 }
0x1234   : > { %v2665_v15 = vpop.permute.xlu1 %2664 }
0x1235   : > { %v2686_v5 = vsel %vm568_vm1, %v4516_v45, %v2665_v15 }
0x1238   : > { %v2667_v24 = vpop.permute.xlu1 %2666 }
0x1239   : > { %v2687_v2 = vsel %vm568_vm1, %v4514_v44, %v2667_v24 }
0x123c   : > { %v2675_v17 = vpop.permute.xlu1 %2674 }
0x123d   : > { %v2689_v18 = vsel %vm1391_vm3, %v2687_v2, %v2675_v17 }
0x123e   : > { %v3818_v53 = vpop.eup %3817 }
0x123f   : > { %v2568_v59 = vsel %vm568_vm1, %v3818_v53, 0.0 }
0x1240   : > { %v3820_v48 = vpop.eup %3819  ;;  %2569 = vadd.xlane.f32.xlu0 %v2568_v59 }
0x1241   : > { %v2565_v47 = vsel %vm568_vm1, %v3820_v48, 0.0 }
0x1244   : > { %2566 = vadd.xlane.f32.xlu0 %v2565_v47 }
0x125a   : > { %2575 = vrot.lane.b32.xlu0 %v4456_v16, %s3999_s25  ;;  %s3915_s25 = scalar_lea.vmem %s4643_s23, 32 }
0x125b   : > { %p3916_p9 = scmp.ne.s32.totalorder %s4643_s23, %s3915_s25  ;;  %p3923_p8 = scmp.lt.s32.totalorder %s3921_s26, %s3915_s25 }
0x125d   : > { %p3917_p10 = pnand %p3916_p9, %p4087_p5  ;;  %p3924_p11 = por %p3923_p8, %p3922_p7 }
0x125e   : > { %2672 = vrot.lane.b32.xlu0 %v2451_v25, %s3996_s20 }
0x125f   : > { %p3918_p13 = pneg %p3917_p10 }
0x1261   : > { %p3925_p0 = pnand %p3924_p11, %p3918_p13 }
0x12c9   : > { %v2570_v60 = vpop.xlane.xlu0 %2569 }
0x12ca   : > { %3821 = vrcp.f32 %v2570_v60 }
0x12cd   : > { %v2567_v61 = vpop.xlane.xlu0 %2566 }
0x12ce   : > { %3823 = vrcp.f32 %v2567_v61 }
0x12d1   : > { %v2576_v62 = vpop.permute.xlu0 %2575 }
0x12d2   : > { %3569 = vmatprep.subr.mxu0 %v2576_v62 }
0x12d3   : > { %3570 = vmatpush3.msra.mxu0 %v2576_v62 }
0x12d4   : > { %3574 = vmatprep.subr.mxu0 %v4000_v52 }
0x12d5   : > { %v2673_v1 = vpop.permute.xlu0 %2672 }
0x12d6   : > { %v2688_v7 = vsel %vm1391_vm3, %v2686_v5, %v2673_v1 }
0x12d7   : > { %v3822_v63 = vpop.eup %3821 }
0x12d8   : > { %v2574_v27 = vmul.f32 %v3822_v63, %v3818_v53 }
0x12db   : > { %v3824_v31 = vpop.eup %3823 }
0x12dc   : > { %v2573_v11 = vmul.f32 %v3824_v31, %v3820_v48 }
0x12de   : > { %3571 = vmatprep.mubr.msk.f32.mxu0 %vm568_vm1, %v2573_v11 }
0x12df   : > { %3572 = vmatmul.mubr.msk.f32.vlgmr.msra.gmra.mxu0 %vm568_vm1, %v2574_v27 }
0x12e0   : > { %3575 = vmatpush3.xpose.msk.msra.mxu0 %vm468_vm0, %v3835_v20  ;;  %3578 = vmatprep.mubr.msk.f32.mxu0 %vm4001_vm2, %v4000_v52 }
0x12e1   : > { %3576 = vmatprep.subr.mxu0 %v4000_v52 }
0x12e4   : > { %3577 = vmatpush3.xpose.msk.msra.mxu0 %vm468_vm0, %v4552_v21 }
0x12e5   : > { %3600 = vmatprep.subr.bf16.mxu0 %v4000_v52 }
0x139f   : > { %v3573_v16 = vpop.f32.mrf.mxu0 }
0x13a0   : > { %2682 = vrot.lane.b32.xlu1 %v3573_v16, %s3994_s22 }
0x13a1   : > { %v2653_v0 = vpop.f32.mrf.mxu0 }
0x13a2   : > { %2680 = vrot.lane.b32.xlu0 %v2653_v0, %s3994_s22  ;;  %s3283_s22 = sshll.u32 %s4070_s9, 5  ;;  %s4654_s9 = scalar_lea.sflag [#allocation4], %s357_s21 }
0x13a3   : > { %s4649_s17 = scalar_lea.hbm %s4704_s8, %s3283_s22 }
0x1412   : > { %v2683_v4 = vpop.permute.xlu1 %2682 }
0x1413   : > { %v2691_v6 = vsel %vm1394_vm4, %v2689_v18, %v2683_v4 }
0x1414   : > { %3825 = vtanh.f32 %v2691_v6  ;;  %v2681_v8 = vpop.permute.xlu0 %2680 }
0x1415   : > { %v2690_v19 = vsel %vm1394_vm4, %v2688_v7, %v2681_v8 }
0x1416   : > { %3827 = vtanh.f32 %v2690_v19 }
0x1421   : > { %v3826_v9 = vpop.eup %3825 }
0x1422   : > { %v2695_v23 = vsel %vm468_vm0, %v3826_v9, 0.0 }
0x1423   : > { %v3828_v20 = vpop.eup %3827 }
0x1424   : > { %v2694_v44 = vsel %vm468_vm0, %v3828_v20, 0.0 }
0x1425   : > { %v2696_v25 = vadd.f32 %v2695_v23, %v2694_v44 }
0x1427   : > { %v2697_v14 = vrot.slane %v2696_v25, 4 }
0x1429   : > { %v2698_v29 = vadd.f32 %v2697_v14, %v2696_v25 }
0x142b   : > { %v2699_v30 = vrot.slane %v2698_v29, 2 }
0x142d   : > { %v2700_v45 = vadd.f32 %v2699_v30, %v2698_v29 }
0x142f   : > { %v2701_v35 = vrot.slane %v2700_v45, 1 }
0x1431   : > { %v2702_v38 = vadd.f32 %v2701_v35, %v2700_v45 }
0x1433   : > { %3579 = vmatmul.mubr.msk.f32.vlgmr.msra.gmra.mxu0 %vm468_vm0, %v2702_v38 }
0x1434   : > { %3601 = vmatpush3.bf16.msra.mxu0 %v4364_v22  ;;  %3608 = vmatprep.mubr.msk.bf16.mxu0 %vm4001_vm2, %v4000_v52 }
0x1435   : > { %3602 = vmatprep.subr.bf16.mxu0 %v4000_v52 }
0x1438   : > { %3603 = vmatpush3.bf16.msra.mxu0 %v4367_v10 }
0x1439   : > { %3604 = vmatprep.subr.bf16.mxu0 %v4000_v52 }
0x143c   : > { %3605 = vmatpush3.bf16.msra.mxu0 %v4371_v26 }
0x143d   : > { %3606 = vmatprep.subr.bf16.mxu0 %v4000_v52 }
0x1440   : > { %3607 = vmatpush3.bf16.msra.mxu0 %v4375_v28  ;;  %v2867_v28 = vrot.slane %v3828_v20, 7 }
0x1441   : > { %3624 = vmatprep.subr.bf16.mxu0 %v4000_v52 }
0x1442   : > { %v2869_v53 = vsel %vm1575_vm6, %v4552_v21, %v2867_v28 }
0x14f3   : > { %v2778_v40 = vpop.f32.mrf.mxu0 }
0x14f4   : > { %v2782_v22 = vsel %vm1487_vm5, %v2778_v40, -inf }
0x14f5   : > { %2783 = vmax.xlane.f32.xlu0 %v2782_v22  ;;  %v3580_v33 = vpop.f32.mrf.mxu0 }
0x157e   : > { %v2784_v54 = vpop.xlane.xlu0 %2783 }
0x157f   : > { %v2785_v55 = vsub.f32 %v2778_v40, %v2784_v54 }
0x1581   : > { %v2786_v56 = vmul.f32 1.442695, %v2785_v55 }
0x1583   : > { %3829 = vpow2.f32 %v2786_v56 }
0x1590   : > { %v3830_v10 = vpop.eup %3829 }
0x1591   : > { %v2788_v13 = vsel %vm1487_vm5, %v3830_v10, 0.0 }
0x1592   : > { %2789 = vadd.xlane.f32.xlu1 %v2788_v13 }
0x161b   : > { %v2790_v26 = vpop.xlane.xlu1 %2789 }
0x161c   : > { %3831 = vrcp.f32 %v2790_v26 }
0x1629   : > { %v3832_v57 = vpop.eup %3831 }
0x162a   : > { %v2792_v58 = vmul.f32 %v3832_v57, %v3830_v10 }
0x162c   : > { %3586 = vmatmul.mubr.msk.f32.vlgmr.msra.gmra.mxu1 %vm568_vm1, %v2792_v58 }
0x162d   : > { %3589 = vmatpush3.bf16.msra.mxu1 %v4380_v32  ;;  %3596 = vmatprep.mubr.msk.bf16.mxu1 %vm4001_vm2, %v4000_v52  ;;  %v2870_v32 = vpack.c.bf16 %v2869_v53, %v2869_v53 }
0x162e   : > { %3590 = vmatprep.subr.bf16.mxu1 %v4000_v52 }
0x1631   : > { %3591 = vmatpush3.bf16.msra.mxu1 %v4384_v36 }
0x1632   : > { %3592 = vmatprep.subr.bf16.mxu1 %v4000_v52 }
0x1635   : > { %3593 = vmatpush3.bf16.msra.mxu1 %v4390_v37 }
0x1636   : > { %3594 = vmatprep.subr.bf16.mxu1 %v4000_v52 }
0x1639   : > { %3595 = vmatpush3.bf16.msra.mxu1 %v4395_v39 }
0x163a   : > { %3612 = vmatprep.subr.bf16.mxu1 %v4000_v52 }
0x163c   : > { %3597 = vmatmul.mubr.msk.bf16.vlgmr.msra.gmra.mxu1 %vm468_vm0, %v2870_v32 }
0x163d   : > { %3613 = vmatpush3.bf16.msra.mxu1 %v4401_v41  ;;  %3620 = vmatprep.mubr.msk.bf16.mxu1 %vm4001_vm2, %v4000_v52 }
0x163e   : > { %3614 = vmatprep.subr.bf16.mxu1 %v4000_v52 }
0x1641   : > { %3615 = vmatpush3.bf16.msra.mxu1 %v4406_v42 }
0x1642   : > { %3616 = vmatprep.subr.bf16.mxu1 %v4000_v52 }
0x1645   : > { %3617 = vmatpush3.bf16.msra.mxu1 %v4412_v12 }
0x1646   : > { %3618 = vmatprep.subr.bf16.mxu1 %v4000_v52 }
0x1649   : > { %3619 = vmatpush3.bf16.msra.mxu1 %v4416_v43 }
0x16ec   : > { %v2862_v36 = vpop.f32.mrf.mxu1 }
0x16ed   : > { %v2916_v37 = vpack.c.bf16 %v2862_v36, %v2862_v36 }
0x16ee   : > { %v3587_v39 = vpop.f32.mrf.mxu1 }
0x16ef   : > { %3609 = vmatmul.mubr.msk.bf16.vlgmr.msra.gmra.mxu0 %vm468_vm0, %v2916_v37 }
0x16f0   : > { %3625 = vmatpush3.bf16.msra.mxu0 %v4421_v46  ;;  %3632 = vmatprep.mubr.msk.bf16.mxu0 %vm4001_vm2, %v4000_v52 }
0x16f1   : > { %3626 = vmatprep.subr.bf16.mxu0 %v4000_v52 }
0x16f4   : > { %3627 = vmatpush3.bf16.msra.mxu0 %v4425_v49 }
0x16f5   : > { %3628 = vmatprep.subr.bf16.mxu0 %v4000_v52 }
0x16f8   : > { %3629 = vmatpush3.bf16.msra.mxu0 %v4431_v50 }
0x16f9   : > { %3630 = vmatprep.subr.bf16.mxu0 %v4000_v52 }
0x16fc   : > { %v2908_v41 = vpop.f32.mrf.mxu1  ;;  %3631 = vmatpush3.bf16.msra.mxu0 %v4435_v51 }
0x16fd   : > { %v2909_v42 = vadd.f32 %v4441_v34, %v2908_v41 }
0x16fe   : > { %v3598_v12 = vpop.f32.mrf.mxu1 }
0x16ff   : > { %3833 = vtanh.f32 %v2909_v42 }
0x1700   : > { %v2911_v43 = vpop.f32.mrf.mxu1 }
0x1702   : > { %v3599_v46 = vpop.f32.mrf.mxu1 }
0x170c   : > { %v3834_v21 = vpop.eup %3833 }
0x170d   : > { %v2915_v59 = vpack.c.bf16 %v3834_v21, %v3834_v21 }
0x170f   : > { %v3003_v49 = vshrl.u32 %v2915_v59, 16  ;;  %3621 = vmatmul.mubr.msk.bf16.vlgmr.msra.gmra.mxu1 %vm468_vm0, %v2915_v59 }
0x1711   : > { %3633 = vmatmul.mubr.msk.bf16.vlgmr.msra.gmra.mxu0 %vm468_vm0, %v3003_v49 }
0x17af   : > { %v2954_v50 = vpop.f32.mrf.mxu0 }
0x17b1   : > { %v3610_v52 = vpop.f32.mrf.mxu0 }
0x17b3   : > { %v2957_v48 = vpop.f32.mrf.mxu0 }
0x17b5   : > { %v3611_v51 = vpop.f32.mrf.mxu0 }
0x17cf   : > { %v2997_v47 = vpop.f32.mrf.mxu1 }
0x17d0   : > { %v2998_v34 = vadd.f32 %v2997_v47, %v2954_v50 }
0x17d1   : > { %v3622_v60 = vpop.f32.mrf.mxu1  ;;  %v3042_v61 = vpop.f32.mrf.mxu0 }
0x17d2   : > { %v3048_v62 = vadd.f32 %v3042_v61, %v2998_v34 }
0x17d3   : > { %v3000_v63 = vpop.f32.mrf.mxu1  ;;  %v3634_v31 = vpop.f32.mrf.mxu0 }
0x17d4   : > { %v3049_v11 = vadd.f32 %v3048_v62, %v4478_v3 }
0x17d5   : > { %v3623_v27 = vpop.f32.mrf.mxu1  ;;  %v3045_v16 = vpop.f32.mrf.mxu0 }
0x17d6   : > { %3277 = vst [vmem:[%s4481_s13 + $0x1] sm:$0x1] %v3049_v11 }
0x17d7   : > { %v3635_v0 = vpop.f32.mrf.mxu0 }
0x17d8   : > { %3928 = shalt.err (!%p3925_p0)
}
0x17d9   : > { %s3929_s21 = scalar_lea.hbm %s4649_s17, 32  ;;  %s3933_s22 = scalar_lea.hbm %s4704_s8, 64 }
0x17da   : > { %p3930_p1 = scmp.ne.s32.totalorder %s4649_s17, %s3929_s21  ;;  %p3934_p4 = scmp.lt.s32.totalorder %s4649_s17, %s4704_s8 }
0x17db   : > { %p3935_p12 = scmp.lt.s32.totalorder %s3933_s22, %s3929_s21 }
0x17dc   : > { %p3931_p2 = pnand %p3930_p1, %p4087_p5 }
0x17dd   : > { %p3936_p9 = por %p3935_p12, %p3934_p4 }
0x17de   : > { %p3932_p3 = pneg %p3931_p2 }
0x17e0   : > { %p3937_p10 = pnand %p3936_p9, %p3932_p3 }
0x17e2   : > { %3940 = shalt.err (!%p3937_p10)
}
0x17e3   : > { %s4003_s25 = smov 1  }
0x17e4   : > { %3648 = dma.vmem_to_hbm [thread:$0]  (%p4087_p5), %s4643_s23, 32, %s4649_s17, %s4654_s9, %s3998_s24, %s3998_s24, %s4003_s25  }
0x17e5 PF: > { %p3670_p13 = scmp.ge.s32.totalorder %s3983_s30, 2  ;;  %s3081_s18 = sand.u32 1, %s3971_s27  }
0x17e6   : > { %s3082_s19 = scalar_lea.sflag [#allocation4], %s3081_s18 }
0x17e7   : > { %p3661_p7 = pnand %p3670_p13, %p4091_p6 }
0x17e9   : > { %p3662_p8 = pneg %p3661_p7 }
0x17eb   : > { %3966 = dma.done.wait (%p3662_p8), %s3082_s19, 32  }
0x17ec   : > { %3968 = vsyncadd (%p3662_p8), %s3082_s19, 4294967264  ;;  %p20_p11 = scmp.ge.s32.totalorder %s4074_s11, 4   ;;  %s4709_s27 = smov %s3975_s28 }
0x17ed   : > { %s4710_s28 = smov %s3979_s29  ;;  %s4711_s29 = smov %s4085_s14 }
0x17ee   : > { %s4712_s30 = smov %s4074_s11  ;;  %22 = sbr.rel (!%p20_p11) target bundleno = 5 (0x5), region = 104 }
0x17f3   :  { %3087 = vsyncpa [#allocation3], 1 }
0x17f4   :  { %3089 = vsyncpa [#allocation3 + $0x1], 1 }
0x17f5   :  { %3090 = vsyncpa [#allocation6], 1 }
0x17f6   :  { %3091 = vsyncpa [#allocation4], 1 }
0x17f7   :  { %3093 = vsyncpa [#allocation4 + $0x1], 1 }

</bundles_post_ra>
